<compile_context>
chip_gen: v7x
topology: tpu7x:2x2x1
jax: 0.10.0
libtpu: 0.0.40
codegen_flags: <defaults>
</compile_context>

<pallas_src>
import functools

import jax
import jax.numpy as jnp
from jax import lax
from jax.experimental import pallas as pl
from jax.experimental.pallas import tpu as pltpu


def _node_attention_kernel(x_ref, wqkv_ref, wl_ref, bl_ref, gamma_ref,
                           beta_ref, o_ref, *, n_heads, d_qkv, residual, eps,
                           mxu_dtype, approx_recip):
    tb, n, d = x_ref.shape
    r = tb * n
    hdq = n_heads * d_qkv

    # Leading-dim collapse only (lane dim unchanged) -> free reshape.
    x = x_ref[...].reshape(r, d).astype(jnp.float32)   # f32 residual / LN path
    x_mm = x.astype(mxu_dtype)

    # --- fused QKV projection: one MXU matmul, (r, d) @ (d, 3*hdq) ---
    qkv = jnp.dot(x_mm, wqkv_ref[...].astype(mxu_dtype),
                  preferred_element_type=jnp.float32)          # (r, 3*hdq) f32

    # --- block-diagonal additive mask, built in-kernel (hoisted, once/step) ---
    # group(p) = p // n, computed as trunc((p + 0.5) * (1/n)): the 0.5 offset
    # keeps the value safely inside (k, k+1) so a ~1-ulp multiply error can
    # never flip the truncated group id.  Only iota / cast / mul / cmp / select.
    inv_n = 1.0 / float(n)
    row_grp = ((lax.broadcasted_iota(jnp.int32, (r, r), 0).astype(jnp.float32)
                + 0.5) * inv_n).astype(jnp.int32)
    col_grp = ((lax.broadcasted_iota(jnp.int32, (r, r), 1).astype(jnp.float32)
                + 0.5) * inv_n).astype(jnp.int32)
    neg_mask = jnp.where(row_grp == col_grp,
                         jnp.float32(0.0), jnp.float32(-1e9))   # (r, r)

    scale = 1.0 / (float(d_qkv) ** 0.5)
    wl = wl_ref[...].astype(mxu_dtype)                          # (hdq, d)

    # --- per-head attention + distributed output projection (no concat) ---
    ff = jnp.zeros((r, d), jnp.float32)
    for h in range(n_heads):
        q_h = qkv[:, h * d_qkv:(h + 1) * d_qkv] * scale
        k_h = qkv[:, hdq + h * d_qkv: hdq + (h + 1) * d_qkv]
        v_h = qkv[:, 2 * hdq + h * d_qkv: 2 * hdq + (h + 1) * d_qkv]

        # NT contraction: contract the d_qkv dims directly (no k_h.T relayout).
        s = lax.dot_general(q_h.astype(mxu_dtype), k_h.astype(mxu_dtype),
                            dimension_numbers=(((1,), (1,)), ((), ())),
                            preferred_element_type=jnp.float32)  # (r, r)
        s = s + neg_mask
        s = s - jnp.max(s, axis=-1, keepdims=True)
        p = jnp.exp(s)                                           # unnormalized
        denom = jnp.sum(p, axis=-1, keepdims=True)               # (r, 1)
        # TODO(synk): attention dropout (nn.Dropout) is identity in eval mode; not applied.

        pv = jnp.dot(p.astype(mxu_dtype), v_h.astype(mxu_dtype),
                     preferred_element_type=jnp.float32)         # (r, d_qkv)
        # Normalize AFTER the PV matmul: scale the small (r, d_qkv) tile, not
        # the (r, r) probability matrix (mathematically identical).
        pv = pv * pl.reciprocal(denom, approx=approx_recip)
        # Fold this head's slice of the output projection directly into ff.
        ff = ff + jnp.dot(pv.astype(mxu_dtype),
                          wl[h * d_qkv:(h + 1) * d_qkv, :],
                          preferred_element_type=jnp.float32)    # (r, d)

    # --- feedforward bias + ReLU ---
    ff = jnp.maximum(ff + bl_ref[...], 0.0)

    # --- residual + LayerNorm(eps=1e-6) over feature dim, all f32 ---
    y = ff + x if residual else ff
    mu = jnp.mean(y, axis=-1, keepdims=True)
    var = jnp.mean((y - mu) * (y - mu), axis=-1, keepdims=True)
    y = (y - mu) * lax.rsqrt(var + eps)
    y = y * gamma_ref[...] + beta_ref[...]

    o_ref[...] = y.reshape(tb, n, d).astype(o_ref.dtype)         # free reshape


def _chip_tuning():
    """Per-chip defaults: target rows per grid step and whether the chip has
    two TensorCores (v7x).  Falls back to v6e-style defaults."""
    try:
        kind = jax.devices()[0].device_kind.lower()
    except Exception:
        kind = ""
    is_v5 = "v5" in kind
    two_cores = "v7" in kind
    return (128 if is_v5 else 256), two_cores


def _pick_tb_tile(total, cap):
    """Largest divisor of `total` <= cap if it is within 2x of the cap (avoids
    the zero-pad HBM copy entirely); otherwise use cap and pad the tail."""
    cap = max(1, min(cap, total))
    div = 1
    for d in range(cap, 0, -1):
        if total % d == 0:
            div = d
            break
    if 2 * div >= cap:
        return div, total
    return cap, pl.cdiv(total, cap) * cap


def node_attention_forward(inputs, params, *, num_state, n_heads, d_qkv,
                           residual=True, eps=1e-6,
                           mxu_dtype=jnp.bfloat16, approx_recip=True,
                           target_rows=None, out_dtype=jnp.float32):
    """inputs: [T, B*num_state, D] float32 (same convention as the PyTorch module).

    out_dtype=jnp.bfloat16 halves output DMA / masked-store work if the
    consumer accepts it; default stays f32 for spec fidelity."""
    T, BN, D = inputs.shape
    assert BN % num_state == 0
    B = BN // num_state
    N = num_state
    Hdq = n_heads * d_qkv
    TB = T * B

    auto_rows, two_cores = _chip_tuning()
    if target_rows is None:
        target_rows = auto_rows     # 128 on v5e, 256 on v6e/v7x

    cap = max(1, min(TB, target_rows // max(N, 1)))
    if two_cores and TB >= 2:
        # v7x only (2 TensorCores): keep >= 2 grid steps per core when TB
        # permits so block DMAs overlap compute.  On 1-TC chips this cap would
        # only shrink R and add per-step overhead, so it is not applied there.
        min_blocks = 4 if TB >= 4 else 2
        cap = min(cap, max(1, TB // min_blocks))
    tb_tile, tb_pad = _pick_tb_tile(TB, cap)
    R = tb_tile * N

    # x stays in its original (f32) dtype: no wrapper-side astype HBM pass;
    # the kernel casts the MXU operands itself.
    x = inputs.reshape(TB, N, D)
    if tb_pad != TB:
        # Rare fallback (TB has no decent divisor <= cap): pad with whole zero
        # (t, b) slices; they form their own attention groups, produce finite
        # garbage and are sliced off below.
        x = jnp.concatenate(
            [x, jnp.zeros((tb_pad - TB, N, D), x.dtype)], axis=0)

    # Fused QKV weight and output projection (torch Linear stores (out, in)).
    w_qkv = jnp.concatenate(
        [params["Wq"], params["Wk"], params["Wv"]], axis=1).astype(mxu_dtype)
    w_lin = params["lin_w"].T.astype(mxu_dtype)                 # (Hdq, D)
    b_lin = params["lin_b"].reshape(1, D).astype(jnp.float32)
    gamma = params["ln_w"].reshape(1, D).astype(jnp.float32)
    beta = params["ln_b"].reshape(1, D).astype(jnp.float32)

    kernel = functools.partial(
        _node_attention_kernel, n_heads=n_heads, d_qkv=d_qkv,
        residual=residual, eps=eps, mxu_dtype=mxu_dtype,
        approx_recip=approx_recip)

    const = lambda i: (0, 0)
    grid_spec = pltpu.PrefetchScalarGridSpec(
        num_scalar_prefetch=0,
        grid=(tb_pad // tb_tile,),
        in_specs=[
            pl.BlockSpec((tb_tile, N, D), lambda i: (i, 0, 0)),  # x row block
            pl.BlockSpec((D, 3 * Hdq), const),                   # fused Wqkv
            pl.BlockSpec((Hdq, D), const),                       # lin weight^T
            pl.BlockSpec((1, D), const),                         # lin bias
            pl.BlockSpec((1, D), const),                         # LN gamma
            pl.BlockSpec((1, D), const),                         # LN beta
        ],
        out_specs=pl.BlockSpec((tb_tile, N, D), lambda i: (i, 0, 0)),
    )

    out = pl.pallas_call(
        kernel,
        out_shape=jax.ShapeDtypeStruct((tb_pad, N, D), out_dtype),
        grid_spec=grid_spec,
        compiler_params=pltpu.CompilerParams(
            dimension_semantics=("parallel",)),
    )(x, w_qkv, w_lin, b_lin, gamma, beta)

    return out[:TB].reshape(T, B * N, D)


def node_attention_reference(inputs, params, *, num_state, n_heads, d_qkv,
                             residual=True, eps=1e-6):
    """Pure-JAX f32 reference mirroring the PyTorch forward."""
    T, BN, D = inputs.shape
    B = BN // num_state
    N = num_state
    q = jnp.einsum("tnd,de->tne", inputs, params["Wq"])
    k = jnp.einsum("tnd,de->tne", inputs, params["Wk"])
    v = jnp.einsum("tnd,de->tne", inputs, params["Wv"])
    rs = lambda a: a.reshape(T, B, N, n_heads, d_qkv).transpose(0, 1, 3, 2, 4)
    q_, k_, v_ = rs(q), rs(k), rs(v)                                  # (T,B,H,N,dq)
    s = jnp.einsum("tbhnd,tbhmd->tbhnm", q_, k_) / (d_qkv ** 0.5)
    p = jax.nn.softmax(s, axis=-1)
    o = jnp.einsum("tbhnm,tbhmd->tbhnd", p, v_)
    o = o.transpose(0, 1, 3, 2, 4).reshape(T, B, N, n_heads * d_qkv)
    ff = jax.nn.relu(jnp.einsum("tbne,ed->tbnd", o, params["lin_w"].T)
                     + params["lin_b"])
    y = ff.reshape(T, B * N, D)
    if residual:
        y = y + inputs
    mu = y.mean(-1, keepdims=True)
    var = ((y - mu) ** 2).mean(-1, keepdims=True)
    return (y - mu) / jnp.sqrt(var + eps) * params["ln_w"] + params["ln_b"]


def init_params(key, input_dim, n_heads, d_qkv):
    """Deterministic synthetic init (kaiming-uniform-like QKV, torch Linear default)."""
    Hdq = n_heads * d_qkv
    k1, k2, k3, k4, k5 = jax.random.split(key, 5)
    qkv_bound = (6.0 / input_dim) ** 0.5
    lin_bound = 1.0 / (Hdq ** 0.5)
    return {
        "Wq": jax.random.uniform(k1, (input_dim, Hdq), jnp.float32, -qkv_bound, qkv_bound),
        "Wk": jax.random.uniform(k2, (input_dim, Hdq), jnp.float32, -qkv_bound, qkv_bound),
        "Wv": jax.random.uniform(k3, (input_dim, Hdq), jnp.float32, -qkv_bound, qkv_bound),
        "lin_w": jax.random.uniform(k4, (input_dim, Hdq), jnp.float32, -lin_bound, lin_bound),
        "lin_b": jax.random.uniform(k5, (input_dim,), jnp.float32, -lin_bound, lin_bound),
        "ln_w": jnp.ones((input_dim,), jnp.float32),
        "ln_b": jnp.zeros((input_dim,), jnp.float32),
    }


if __name__ == "__main__":
    # inputs = [T, B*num_state, input_dim]
    T, B, num_state = 4, 2, 8
    input_dim, n_heads, d_qkv = 32, 2, 16
    residual = True

    key = jax.random.PRNGKey(0)
    kx, kp = jax.random.split(key)
    x = jax.random.normal(kx, (T, B * num_state, input_dim), jnp.float32)
    params = init_params(kp, input_dim, n_heads, d_qkv)

    ref = node_attention_reference(x, params, num_state=num_state,
                                   n_heads=n_heads, d_qkv=d_qkv, residual=residual)

    # 1) f32-MXU configuration (exact reciprocal): tight check.  Note the MXU
    #    runs f32 via multi-pass emulation, so this is near- but not bit-exact.
    out_exact = node_attention_forward(
        x, params, num_state=num_state, n_heads=n_heads, d_qkv=d_qkv,
        residual=residual, mxu_dtype=jnp.float32, approx_recip=False)
    out_exact = jax.block_until_ready(out_exact)
    assert out_exact.shape == (T, B * num_state, input_dim)
    assert jnp.allclose(out_exact, ref, atol=1e-4, rtol=1e-4), "f32 mismatch vs reference"

    # 2) performance configuration (bf16 MXU operands, EUP approx reciprocal).
    #    Residual/LN path is full f32 even here (x is never rounded to bf16).
    out_fast = node_attention_forward(
        x, params, num_state=num_state, n_heads=n_heads, d_qkv=d_qkv,
        residual=residual, mxu_dtype=jnp.bfloat16, approx_recip=True)
    out_fast = jax.block_until_ready(out_fast)
    assert out_fast.shape == (T, B * num_state, input_dim)
    assert bool(jnp.isfinite(out_fast).all())
    rel_err = jnp.linalg.norm(out_fast - ref) / jnp.linalg.norm(ref)
    assert float(rel_err) < 5e-2, f"bf16 relative error too large: {float(rel_err)}"

    print("KERNEL_OK")
</pallas_src>

<mosaic_0001>
module attributes {stable_mosaic.version = 11 : i64} {
  func.func @_node_attention_kernel(%arg0: i32, %arg1: memref<8x8x32xf32, #tpu.memory_space<vmem>>, %arg2: memref<32x96xf32, #tpu.memory_space<vmem>>, %arg3: memref<32x32xf32, #tpu.memory_space<vmem>>, %arg4: memref<1x32xf32, #tpu.memory_space<vmem>>, %arg5: memref<1x32xf32, #tpu.memory_space<vmem>>, %arg6: memref<1x32xf32, #tpu.memory_space<vmem>>, %arg7: memref<8x8x32xf32, #tpu.memory_space<vmem>>) attributes {dimension_semantics = [#tpu.dimension_semantics<parallel>], iteration_bounds = array<i64: 1>, scalar_prefetch = 0 : i64, scratch_operands = 0 : i64, tpu.core_type = #tpu.core_type<tc>, window_params = [{transform_indices = @transform_0, window_bounds = array<i64: 8, 8, 32>}, {pipeline_mode = #tpu.pipeline_mode<synchronous>, transform_indices = @transform_1, window_bounds = array<i64: 32, 96>}, {pipeline_mode = #tpu.pipeline_mode<synchronous>, transform_indices = @transform_2, window_bounds = array<i64: 32, 32>}, {pipeline_mode = #tpu.pipeline_mode<synchronous>, transform_indices = @transform_3, window_bounds = array<i64: 1, 32>}, {pipeline_mode = #tpu.pipeline_mode<synchronous>, transform_indices = @transform_4, window_bounds = array<i64: 1, 32>}, {pipeline_mode = #tpu.pipeline_mode<synchronous>, transform_indices = @transform_5, window_bounds = array<i64: 1, 32>}, {transform_indices = @transform_6, window_bounds = array<i64: 8, 8, 32>}]} {
    %c0 = arith.constant 0 : index
    %c0_0 = arith.constant 0 : index
    %c0_1 = arith.constant 0 : index
    %0 = vector.load %arg1[%c0, %c0_0, %c0_1] : memref<8x8x32xf32, #tpu.memory_space<vmem>>, vector<8x8x32xf32>
    %1 = vector.shape_cast %0 : vector<8x8x32xf32> to vector<64x32xf32>
    %c0_2 = arith.constant 0 : index
    %c0_3 = arith.constant 0 : index
    %2 = vector.load %arg2[%c0_2, %c0_3] : memref<32x96xf32, #tpu.memory_space<vmem>>, vector<32x96xf32>
    %cst = arith.constant dense<0.000000e+00> : vector<64x96xf32>
    %3 = tpu.matmul %1, %2, %cst {dimension_numbers = #tpu.dot_dimension_numbers<[1], [0], [0], [1], [0, 0, 1, 1], [], []>} : vector<64x32xf32>, vector<32x96xf32>, vector<64x96xf32> -> vector<64x96xf32>
    %4 = tpu.iota {dimensions = array<i32: 0>} : vector<64x64xi32>
    %5 = arith.sitofp %4 : vector<64x64xi32> to vector<64x64xf32>
    %cst_4 = arith.constant 5.000000e-01 : f32
    %6 = vector.broadcast %cst_4 : f32 to vector<64x64xf32>
    %7 = arith.addf %5, %6 : vector<64x64xf32>
    %cst_5 = arith.constant 1.250000e-01 : f32
    %8 = vector.broadcast %cst_5 : f32 to vector<64x64xf32>
    %9 = arith.mulf %7, %8 : vector<64x64xf32>
    %10 = arith.fptosi %9 : vector<64x64xf32> to vector<64x64xi32>
    %11 = tpu.iota {dimensions = array<i32: 1>} : vector<64x64xi32>
    %12 = arith.sitofp %11 : vector<64x64xi32> to vector<64x64xf32>
    %cst_6 = arith.constant 5.000000e-01 : f32
    %13 = vector.broadcast %cst_6 : f32 to vector<64x64xf32>
    %14 = arith.addf %12, %13 : vector<64x64xf32>
    %cst_7 = arith.constant 1.250000e-01 : f32
    %15 = vector.broadcast %cst_7 : f32 to vector<64x64xf32>
    %16 = arith.mulf %14, %15 : vector<64x64xf32>
    %17 = arith.fptosi %16 : vector<64x64xf32> to vector<64x64xi32>
    %18 = arith.cmpi eq, %10, %17 : vector<64x64xi32>
    %cst_8 = arith.constant 0.000000e+00 : f32
    %cst_9 = arith.constant -1.000000e+09 : f32
    %19 = vector.broadcast %cst_8 : f32 to vector<64x64xf32>
    %20 = vector.broadcast %cst_9 : f32 to vector<64x64xf32>
    %21 = arith.select %18, %19, %20 : vector<64x64xi1>, vector<64x64xf32>
    %c0_10 = arith.constant 0 : index
    %c0_11 = arith.constant 0 : index
    %22 = vector.load %arg3[%c0_10, %c0_11] : memref<32x32xf32, #tpu.memory_space<vmem>>, vector<32x32xf32>
    %cst_12 = arith.constant 0.000000e+00 : f32
    %23 = vector.broadcast %cst_12 : f32 to vector<64x32xf32>
    %24 = vector.extract_strided_slice %3 {offsets = [0, 0], sizes = [64, 16], strides = [1, 1]} : vector<64x96xf32> to vector<64x16xf32>
    %cst_13 = arith.constant 2.500000e-01 : f32
    %25 = vector.broadcast %cst_13 : f32 to vector<64x16xf32>
    %26 = arith.mulf %24, %25 : vector<64x16xf32>
    %27 = vector.extract_strided_slice %3 {offsets = [0, 32], sizes = [64, 16], strides = [1, 1]} : vector<64x96xf32> to vector<64x16xf32>
    %28 = vector.extract_strided_slice %3 {offsets = [0, 64], sizes = [64, 16], strides = [1, 1]} : vector<64x96xf32> to vector<64x16xf32>
    %cst_14 = arith.constant dense<0.000000e+00> : vector<64x64xf32>
    %29 = tpu.matmul %26, %27, %cst_14 {dimension_numbers = #tpu.dot_dimension_numbers<[1], [1], [0], [0], [0, 0, 1, 0], [], []>} : vector<64x16xf32>, vector<64x16xf32>, vector<64x64xf32> -> vector<64x64xf32>
    %30 = arith.addf %29, %21 : vector<64x64xf32>
    %cst_15 = arith.constant dense<0xFF800000> : vector<64xf32>
    %31 = vector.multi_reduction <maximumf>, %30, %cst_15 [1] : vector<64x64xf32> to vector<64xf32>
    %32 = vector.shape_cast %31 : vector<64xf32> to vector<64x1xf32>
    %33 = vector.broadcast %32 : vector<64x1xf32> to vector<64x64xf32>
    %34 = arith.subf %30, %33 : vector<64x64xf32>
    %35 = math.exp %34 : vector<64x64xf32>
    %cst_16 = arith.constant dense<0.000000e+00> : vector<64xf32>
    %36 = vector.multi_reduction <add>, %35, %cst_16 [1] : vector<64x64xf32> to vector<64xf32>
    %37 = vector.shape_cast %36 : vector<64xf32> to vector<64x1xf32>
    %cst_17 = arith.constant dense<0.000000e+00> : vector<64x16xf32>
    %38 = tpu.matmul %35, %28, %cst_17 {dimension_numbers = #tpu.dot_dimension_numbers<[1], [0], [0], [1], [0, 0, 1, 1], [], []>} : vector<64x64xf32>, vector<64x16xf32>, vector<64x16xf32> -> vector<64x16xf32>
    %39 = tpu.reciprocal %37 : vector<64x1xf32> -> vector<64x1xf32>
    %40 = vector.broadcast %39 : vector<64x1xf32> to vector<64x16xf32>
    %41 = arith.mulf %38, %40 : vector<64x16xf32>
    %42 = vector.extract_strided_slice %22 {offsets = [0, 0], sizes = [16, 32], strides = [1, 1]} : vector<32x32xf32> to vector<16x32xf32>
    %cst_18 = arith.constant dense<0.000000e+00> : vector<64x32xf32>
    %43 = tpu.matmul %41, %42, %cst_18 {dimension_numbers = #tpu.dot_dimension_numbers<[1], [0], [0], [1], [0, 0, 1, 1], [], []>} : vector<64x16xf32>, vector<16x32xf32>, vector<64x32xf32> -> vector<64x32xf32>
    %44 = arith.addf %23, %43 : vector<64x32xf32>
    %45 = vector.extract_strided_slice %3 {offsets = [0, 16], sizes = [64, 16], strides = [1, 1]} : vector<64x96xf32> to vector<64x16xf32>
    %cst_19 = arith.constant 2.500000e-01 : f32
    %46 = vector.broadcast %cst_19 : f32 to vector<64x16xf32>
    %47 = arith.mulf %45, %46 : vector<64x16xf32>
    %48 = vector.extract_strided_slice %3 {offsets = [0, 48], sizes = [64, 16], strides = [1, 1]} : vector<64x96xf32> to vector<64x16xf32>
    %49 = vector.extract_strided_slice %3 {offsets = [0, 80], sizes = [64, 16], strides = [1, 1]} : vector<64x96xf32> to vector<64x16xf32>
    %cst_20 = arith.constant dense<0.000000e+00> : vector<64x64xf32>
    %50 = tpu.matmul %47, %48, %cst_20 {dimension_numbers = #tpu.dot_dimension_numbers<[1], [1], [0], [0], [0, 0, 1, 0], [], []>} : vector<64x16xf32>, vector<64x16xf32>, vector<64x64xf32> -> vector<64x64xf32>
    %51 = arith.addf %50, %21 : vector<64x64xf32>
    %cst_21 = arith.constant dense<0xFF800000> : vector<64xf32>
    %52 = vector.multi_reduction <maximumf>, %51, %cst_21 [1] : vector<64x64xf32> to vector<64xf32>
    %53 = vector.shape_cast %52 : vector<64xf32> to vector<64x1xf32>
    %54 = vector.broadcast %53 : vector<64x1xf32> to vector<64x64xf32>
    %55 = arith.subf %51, %54 : vector<64x64xf32>
    %56 = math.exp %55 : vector<64x64xf32>
    %cst_22 = arith.constant dense<0.000000e+00> : vector<64xf32>
    %57 = vector.multi_reduction <add>, %56, %cst_22 [1] : vector<64x64xf32> to vector<64xf32>
    %58 = vector.shape_cast %57 : vector<64xf32> to vector<64x1xf32>
    %cst_23 = arith.constant dense<0.000000e+00> : vector<64x16xf32>
    %59 = tpu.matmul %56, %49, %cst_23 {dimension_numbers = #tpu.dot_dimension_numbers<[1], [0], [0], [1], [0, 0, 1, 1], [], []>} : vector<64x64xf32>, vector<64x16xf32>, vector<64x16xf32> -> vector<64x16xf32>
    %60 = tpu.reciprocal %58 : vector<64x1xf32> -> vector<64x1xf32>
    %61 = vector.broadcast %60 : vector<64x1xf32> to vector<64x16xf32>
    %62 = arith.mulf %59, %61 : vector<64x16xf32>
    %63 = vector.extract_strided_slice %22 {offsets = [16, 0], sizes = [16, 32], strides = [1, 1]} : vector<32x32xf32> to vector<16x32xf32>
    %cst_24 = arith.constant dense<0.000000e+00> : vector<64x32xf32>
    %64 = tpu.matmul %62, %63, %cst_24 {dimension_numbers = #tpu.dot_dimension_numbers<[1], [0], [0], [1], [0, 0, 1, 1], [], []>} : vector<64x16xf32>, vector<16x32xf32>, vector<64x32xf32> -> vector<64x32xf32>
    %65 = arith.addf %44, %64 : vector<64x32xf32>
    %c0_25 = arith.constant 0 : index
    %c0_26 = arith.constant 0 : index
    %66 = vector.load %arg4[%c0_25, %c0_26] : memref<1x32xf32, #tpu.memory_space<vmem>>, vector<1x32xf32>
    %67 = vector.broadcast %66 : vector<1x32xf32> to vector<64x32xf32>
    %68 = arith.addf %65, %67 : vector<64x32xf32>
    %cst_27 = arith.constant 0.000000e+00 : f32
    %69 = vector.broadcast %cst_27 : f32 to vector<64x32xf32>
    %70 = arith.maximumf %68, %69 : vector<64x32xf32>
    %71 = arith.addf %70, %1 : vector<64x32xf32>
    %cst_28 = arith.constant dense<0.000000e+00> : vector<64xf32>
    %72 = vector.multi_reduction <add>, %71, %cst_28 [1] : vector<64x32xf32> to vector<64xf32>
    %73 = vector.shape_cast %72 : vector<64xf32> to vector<64x1xf32>
    %cst_29 = arith.constant 3.200000e+01 : f32
    %74 = vector.broadcast %cst_29 : f32 to vector<64x1xf32>
    %75 = arith.divf %73, %74 : vector<64x1xf32>
    %76 = vector.broadcast %75 : vector<64x1xf32> to vector<64x32xf32>
    %77 = arith.subf %71, %76 : vector<64x32xf32>
    %78 = vector.broadcast %75 : vector<64x1xf32> to vector<64x32xf32>
    %79 = arith.subf %71, %78 : vector<64x32xf32>
    %80 = arith.mulf %77, %79 : vector<64x32xf32>
    %cst_30 = arith.constant dense<0.000000e+00> : vector<64xf32>
    %81 = vector.multi_reduction <add>, %80, %cst_30 [1] : vector<64x32xf32> to vector<64xf32>
    %82 = vector.shape_cast %81 : vector<64xf32> to vector<64x1xf32>
    %cst_31 = arith.constant 3.200000e+01 : f32
    %83 = vector.broadcast %cst_31 : f32 to vector<64x1xf32>
    %84 = arith.divf %82, %83 : vector<64x1xf32>
    %85 = vector.broadcast %75 : vector<64x1xf32> to vector<64x32xf32>
    %86 = arith.subf %71, %85 : vector<64x32xf32>
    %cst_32 = arith.constant 9.99999997E-7 : f32
    %87 = vector.broadcast %cst_32 : f32 to vector<64x1xf32>
    %88 = arith.addf %84, %87 : vector<64x1xf32>
    %89 = math.rsqrt %88 : vector<64x1xf32>
    %90 = vector.broadcast %89 : vector<64x1xf32> to vector<64x32xf32>
    %91 = arith.mulf %86, %90 : vector<64x32xf32>
    %c0_33 = arith.constant 0 : index
    %c0_34 = arith.constant 0 : index
    %92 = vector.load %arg5[%c0_33, %c0_34] : memref<1x32xf32, #tpu.memory_space<vmem>>, vector<1x32xf32>
    %93 = vector.broadcast %92 : vector<1x32xf32> to vector<64x32xf32>
    %94 = arith.mulf %91, %93 : vector<64x32xf32>
    %c0_35 = arith.constant 0 : index
    %c0_36 = arith.constant 0 : index
    %95 = vector.load %arg6[%c0_35, %c0_36] : memref<1x32xf32, #tpu.memory_space<vmem>>, vector<1x32xf32>
    %96 = vector.broadcast %95 : vector<1x32xf32> to vector<64x32xf32>
    %97 = arith.addf %94, %96 : vector<64x32xf32>
    %98 = vector.shape_cast %97 : vector<64x32xf32> to vector<8x8x32xf32>
    %c0_37 = arith.constant 0 : index
    %c0_38 = arith.constant 0 : index
    %c0_39 = arith.constant 0 : index
    %99 = vector.load %arg7[%c0_37, %c0_38, %c0_39] : memref<8x8x32xf32, #tpu.memory_space<vmem>>, vector<8x8x32xf32>
    tpu.vector_store %arg7[%c0_37, %c0_38, %c0_39], %98 {strides = array<i32>} : memref<8x8x32xf32, #tpu.memory_space<vmem>>, vector<8x8x32xf32>,
    return
  }
  func.func @transform_0(%arg0: i32) -> (i32, i32, i32) {
    %c0_i32 = arith.constant 0 : i32
    %c0_i32_0 = arith.constant 0 : i32
    %c0_i32_1 = arith.constant 0 : i32
    return %arg0, %c0_i32, %c0_i32_0 : i32, i32, i32
  }
  func.func @transform_1(%arg0: i32) -> (i32, i32) {
    %c0_i32 = arith.constant 0 : i32
    %c0_i32_0 = arith.constant 0 : i32
    %c0_i32_1 = arith.constant 0 : i32
    return %c0_i32, %c0_i32_0 : i32, i32
  }
  func.func @transform_2(%arg0: i32) -> (i32, i32) {
    %c0_i32 = arith.constant 0 : i32
    %c0_i32_0 = arith.constant 0 : i32
    %c0_i32_1 = arith.constant 0 : i32
    return %c0_i32, %c0_i32_0 : i32, i32
  }
  func.func @transform_3(%arg0: i32) -> (i32, i32) {
    %c0_i32 = arith.constant 0 : i32
    %c0_i32_0 = arith.constant 0 : i32
    %c0_i32_1 = arith.constant 0 : i32
    return %c0_i32, %c0_i32_0 : i32, i32
  }
  func.func @transform_4(%arg0: i32) -> (i32, i32) {
    %c0_i32 = arith.constant 0 : i32
    %c0_i32_0 = arith.constant 0 : i32
    %c0_i32_1 = arith.constant 0 : i32
    return %c0_i32, %c0_i32_0 : i32, i32
  }
  func.func @transform_5(%arg0: i32) -> (i32, i32) {
    %c0_i32 = arith.constant 0 : i32
    %c0_i32_0 = arith.constant 0 : i32
    %c0_i32_1 = arith.constant 0 : i32
    return %c0_i32, %c0_i32_0 : i32, i32
  }
  func.func @transform_6(%arg0: i32) -> (i32, i32, i32) {
    %c0_i32 = arith.constant 0 : i32
    %c0_i32_0 = arith.constant 0 : i32
    %c0_i32_1 = arith.constant 0 : i32
    return %arg0, %c0_i32, %c0_i32_0 : i32, i32, i32
  }
}

</mosaic_0001>

<bundles_post_ra>
// kernel: tpu_custom_call.1
= control target key start
LH: loop header
LB: loop body
LE: loop exit
PB: predicated region body
PF: predicated region fallthrough
CT: control target
= control target key end

     0   :  { %11 = vsyncpa [#allocation3], 0  ;;  %s2854_s0 = inlined_call_operand.hbm [shape: f32[8,8,32], index: 0, kind: input, shape index: {}]   ;;  %s2855_s1 = inlined_call_operand.hbm [shape: f32[32,96], index: 1, kind: input, shape index: {}]   ;;  %s2856_s2 = inlined_call_operand.hbm [shape: f32[32,32], index: 2, kind: input, shape index: {}]   ;;  %s2857_s3 = inlined_call_operand.vmem [shape: f32[1,32], index: 3, kind: input, shape index: {}]   ;;  %s2858_s4 = inlined_call_operand.vmem [shape: f32[1,32], index: 4, kind: input, shape index: {}]   ;;  %s2859_s5 = inlined_call_operand.vmem [shape: f32[1,32], index: 5, kind: input, shape index: {}]   ;;  %s2860_s6 = inlined_call_operand.hbm [shape: f32[8,8,32], index: 6, kind: output, shape index: {}]  }
   0x1   :  { %12 = vsyncpa [#allocation6], 0 }
   0x2   :  { %13 = vsyncpa [#allocation4], 0  ;;  %s2293_s21 = smov [#allocation5]   ;;  %s2294_s23 = smov [#allocation2]  }
   0x3   :  { %s31_s22 = sshll.u32 %s2293_s21, 4  ;;  %s19_s24 = sshll.u32 %s2294_s23, 4  ;;  %s32_s22 = int_to_ptr.vmem [resolvable:$true] %s31_s22  ;;  %s2340_s24 = int_to_ptr.vmem [resolvable:$true] %s19_s24 }
   0x4   :  { %s2199_s27 = scalar_lea.hbm %s2855_s1, 512 }
   0x5   :  { %p2200_p0 = scmp.ne.s32.totalorder %s2855_s1, %s2199_s27  ;;  %p2203_p1 = scmp.lt.u32.totalorder %s2199_s27, %s2855_s1 }
   0x7   :  { %p2205_p2 = pnand %p2203_p1, %p2200_p0 }
   0x9   :  { %2208 = shalt.err (!%p2205_p2)
}
   0xa   :  { %s2209_s8 = scalar_lea.vmem %s32_s22, 512  ;;  %p2214_p4 = scmp.lt.s32.totalorder %s32_s22, %s32_s22 }
   0xb   :  { %p2210_p3 = scmp.ne.s32.totalorder %s32_s22, %s2209_s8  ;;  %p2215_p5 = scmp.lt.s32.totalorder %s2209_s8, %s2209_s8 }
   0xd   :  { %p2216_p6 = por %p2215_p5, %p2214_p4 }
   0xf   :  { %p2217_p7 = pnand %p2216_p6, %p2210_p3 }
  0x11   :  { %2220 = shalt.err (!%p2217_p7)
}
  0x12   :  { %s2295_s9 = smov 128   ;;  %s2296_s10 = smov 8  }
  0x13   :  { %37 = dma.hbm_to_vmem [thread:$0]  %s2855_s1, 512, %s32_s22, [#allocation6], %s2295_s9, %s2295_s9, %s2296_s10  }
  0x14   :  { %s2221_s15 = scalar_lea.hbm %s2854_s0, 1024 }
  0x15   :  { %p2222_p8 = scmp.ne.s32.totalorder %s2854_s0, %s2221_s15  ;;  %p2225_p9 = scmp.lt.u32.totalorder %s2221_s15, %s2854_s0 }
  0x17   :  { %p2227_p10 = pnand %p2225_p9, %p2222_p8 }
  0x19   :  { %2230 = shalt.err (!%p2227_p10)
}
  0x1a   :  { %s2231_s20 = scalar_lea.vmem %s2340_s24, 1024  ;;  %p2236_p12 = scmp.lt.s32.totalorder %s2340_s24, %s2340_s24 }
  0x1b   :  { %p2232_p11 = scmp.ne.s32.totalorder %s2340_s24, %s2231_s20  ;;  %p2237_p13 = scmp.lt.s32.totalorder %s2231_s20, %s2231_s20 }
  0x1d   :  { %p2238_p0 = por %p2237_p13, %p2236_p12 }
  0x1f   :  { %p2239_p1 = pnand %p2238_p0, %p2232_p11 }
  0x21   :  { %2242 = shalt.err (!%p2239_p1)
}
  0x22   :  { %25 = dma.hbm_to_vmem [thread:$0]  %s2854_s0, 1024, %s2340_s24, [#allocation3], %s2295_s9, %s2295_s9, %s2296_s10  }
  0x23   :  { %s2297_s22 = smov [#allocation7]   ;;  %s2243_s27 = scalar_lea.hbm %s2856_s2, 512 }
  0x24   :  { %s43_s23 = sshll.u32 %s2297_s22, 4  ;;  %p2244_p2 = scmp.ne.s32.totalorder %s2856_s2, %s2243_s27  ;;  %s44_s23 = int_to_ptr.vmem [resolvable:$true] %s43_s23 }
  0x25   :  { %p2247_p3 = scmp.lt.u32.totalorder %s2243_s27, %s2856_s2 }
  0x27   :  { %p2249_p4 = pnand %p2247_p3, %p2244_p2 }
  0x29   :  { %2252 = shalt.err (!%p2249_p4)
}
  0x2a   :  { %s2253_s8 = scalar_lea.vmem %s44_s23, 512  ;;  %p2258_p6 = scmp.lt.s32.totalorder %s44_s23, %s44_s23 }
  0x2b   :  { %p2254_p5 = scmp.ne.s32.totalorder %s44_s23, %s2253_s8  ;;  %p2259_p7 = scmp.lt.s32.totalorder %s2253_s8, %s2253_s8 }
  0x2d   :  { %p2260_p8 = por %p2259_p7, %p2258_p6 }
  0x2f   :  { %p2261_p9 = pnand %p2260_p8, %p2254_p5 }
  0x31   :  { %2264 = shalt.err (!%p2261_p9)
}
  0x32   :  { %49 = dma.hbm_to_vmem [thread:$0]  %s2856_s2, 512, %s44_s23, [#allocation6], %s2295_s9, %s2295_s9, %s2296_s10  }
  0x33   :  { %2287 = dma.done.wait [#allocation3], 1024  }
  0x34   :  { %2288 = vsyncadd [#allocation3], 4294966272 }
  0x35   :  { %2289 = dma.done.wait [#allocation6], 1024  }
  0x36   :  { %2290 = vsyncadd [#allocation6], 4294966272  ;;  %vm77_vm0 = vcmask 261120   ;;  %v73_v0 = vld [vmem:[#allocation5] sm:$0xff]  ;;  %v74_v1 = vld [vmem:[#allocation5 + $0x8] sm:$0xff]  ;;  %vm306_vm1 = vcmask 130048  }
  0x37   :  { %v75_v2 = vld [vmem:[#allocation5 + $0x10] sm:$0xff]  ;;  %v1889_v3 = vpack.c.bf16 %v74_v1, %v73_v0  ;;  %v76_v4 = vld [vmem:[#allocation5 + $0x18] sm:$0xff]  ;;  %v65_v5 = vld [vmem:[#allocation2] sm:$0xff]  ;;  %s2298_s2 = smov 96   ;;  %s2299_s11 = smov 64   ;;  %vm452_vm6 = vcmask 523264  }
  0x38   :  { %v1893_v6 = vpack.c.bf16 %v76_v4, %v75_v2  ;;  %1733 = vmatprep.mubr.msk.f32.mxu0 %vm77_vm0, %v65_v5  ;;  %v66_v7 = vld [vmem:[#allocation2 + $0x8] sm:$0xff]  ;;  %v67_v8 = vld [vmem:[#allocation2 + $0x10] sm:$0xff]  ;;  %v68_v9 = vld [vmem:[#allocation2 + $0x18] sm:$0xff]  ;;  %s2300_s12 = smov 80   ;;  %s2302_s13 = smov 112  }
  0x39   :  { %1890 = vmatprep.subr.bf16.mxu0 %v1889_v3  ;;  %v69_v10 = vld [vmem:[#allocation2 + $0x20] sm:$0xff]  ;;  %v70_v11 = vld [vmem:[#allocation2 + $0x28] sm:$0xff]  ;;  %v71_v12 = vld [vmem:[#allocation2 + $0x30] sm:$0xff]  ;;  %s2303_s14 = smov 48  }
  0x3a   :  { %1892 = vmatpush3.bf16.msra.mxu0 %v1889_v3  ;;  %v72_v13 = vld [vmem:[#allocation2 + $0x38] sm:$0xff]  ;;  %vm2447_vm2 = vmpackc.low %vm306_vm1, %vm306_vm1 }
  0x3b   :  { %1894 = vmatprep.subr.bf16.mxu0 %v1893_v6 }
  0x3e   :  { %1896 = vmatpush3.bf16.msra.mxu0 %v1893_v6 }
  0x41   :  { %1734 = vmatmul.mubr.msk.f32.vlgmr.msra.gmra.mrb[0].mxu0 %vm77_vm0, %v66_v7 }
  0x42   :  { %1736 = vmatprep.mubr.msk.f32.mxu0 %vm77_vm0, %v67_v8  ;;  %v207_v8 = vlaneseq }
  0x45   :  { %1737 = vmatmul.mubr.msk.f32.gmra.mrb[2].mxu0 %vm77_vm0, %v68_v9  ;;  %v2509_v9 = vshrl.u32 %v207_v8, 7 }
  0x46   :  { %1739 = vmatprep.mubr.msk.f32.mxu0 %vm77_vm0, %v69_v10 }
  0x47   :  { %v209_v10 = vadd.s32 8, %v2509_v9 }
  0x49   :  { %1740 = vmatmul.mubr.msk.f32.gmra.mrb[4].mxu0 %vm77_vm0, %v70_v11  ;;  %v249_v11 = vand.u32 127, %v207_v8 }
  0x4a   :  { %1742 = vmatprep.mubr.msk.f32.mxu0 %vm77_vm0, %v71_v12  ;;  %v217_v12 = vcvt.s32.f32 %v209_v10 }
  0x4d   :  { %1743 = vmatmul.mubr.msk.f32.gmra.mrb[6].mxu0 %vm77_vm0, %v72_v13  ;;  %v250_v13 = vcvt.s32.f32 %v249_v11 }
 0x114   :  { %v2400_v14 = vpop.f32.mrb[0].mxu0 }
 0x115   :  { %v168_v15 = vpop.f32.mrb[1].mxu0  ;;  %v2475_v1 = vmul.f32 0.25, %v2400_v14 }
 0x116   :  { %v2403_v16 = vpack.i.bf16 %v2400_v14, %v168_v15  ;;  %v2405_v17 = vmul.f32 0.25, %v168_v15  ;;  %v211_v14 = vadd.s32 24, %v2509_v9  ;;  %v216_v15 = vcvt.s32.f32 %v2509_v9 }
 0x118   :  { %2032 = vrot.lane.b32.xlu0 %v2403_v16, %s2298_s2  ;;  %v2408_v18 = vpop.f32.mrb[2].mxu0  ;;  %1761 = vmatprep.mubr.msk.f32.mxu1 %vm306_vm1, %v2405_v17 }
 0x119   :  { %v2412_v19 = vpop.f32.mrb[3].mxu0  ;;  %v2485_v3 = vmul.f32 0.25, %v2408_v18 }
 0x11a   :  { %v2416_v20 = vpack.i.bf16 %v2408_v18, %v2412_v19  ;;  %v2478_v2 = vmul.f32 0.25, %v2412_v19  ;;  %v210_v18 = vadd.s32 16, %v2509_v9  ;;  %v225_v19 = vadd.f32 0.5, %v217_v12 }
 0x11c   :  { %2037 = vrot.lane.b32.xlu0 %v2416_v20, %s2298_s2  ;;  %v2419_v21 = vpop.f32.mrb[4].mxu0 }
 0x11d   :  { %v2421_v22 = vpop.f32.mrb[5].mxu0  ;;  %v2495_v5 = vmul.f32 0.25, %v2419_v21 }
 0x11e   :  { %v2425_v23 = vpack.i.bf16 %v2419_v21, %v2421_v22  ;;  %v2488_v4 = vmul.f32 0.25, %v2421_v22  ;;  %v251_v21 = vadd.f32 0.5, %v250_v13  ;;  %v219_v22 = vcvt.s32.f32 %v211_v14 }
 0x120   :  { %2052 = vrot.lane.b32.xlu0 %v2403_v16, %s2299_s11  ;;  %2042 = vrot.lane.b32.xlu1 %v2425_v23, %s2298_s2  ;;  %v2429_v24 = vpop.f32.mrb[6].mxu0 }
 0x121   :  { %v2431_v25 = vpop.f32.mrb[7].mxu0  ;;  %v2505_v7 = vmul.f32 0.25, %v2429_v24 }
 0x122   :  { %v2435_v26 = vpack.i.bf16 %v2429_v24, %v2431_v25  ;;  %v2498_v6 = vmul.f32 0.25, %v2431_v25  ;;  %v213_v24 = vadd.s32 40, %v2509_v9  ;;  %v224_v25 = vadd.f32 0.5, %v216_v15 }
 0x124   :  { %2062 = vrot.lane.b32.xlu0 %v2425_v23, %s2299_s11  ;;  %2047 = vrot.lane.b32.xlu1 %v2435_v26, %s2298_s2 }
 0x128   :  { %2067 = vrot.lane.b32.xlu0 %v2403_v16, %s2300_s12  ;;  %2057 = vrot.lane.b32.xlu1 %v2416_v20, %s2299_s11 }
 0x12c   :  { %2072 = vrot.lane.b32.xlu1 %v2416_v20, %s2300_s12 }
 0x130   :  { %2077 = vrot.lane.b32.xlu1 %v2435_v26, %s2299_s11 }
 0x18a   :  { %v2033_v27 = vpop.permute.xlu0 %2032 }
 0x18b   :  { %v2035_v28 = vunpack.i.h.bf16 %v2033_v27  ;;  %v2034_v29 = vunpack.i.l.bf16 %v2033_v27  ;;  %v218_v27 = vcvt.s32.f32 %v210_v18 }
 0x18d   :  { %v1897_v31 = vpack.c.bf16 %v2035_v28, %v2034_v29  ;;  %v212_v28 = vadd.s32 32, %v2509_v9  ;;  %v233_v29 = vmul.f32 0.125, %v225_v19 }
 0x18e   :  { %v2038_v32 = vpop.permute.xlu0 %2037 }
 0x18f   :  { %v2040_v33 = vunpack.i.h.bf16 %v2038_v32  ;;  %v2039_v34 = vunpack.i.l.bf16 %v2038_v32  ;;  %1899 = vmatprep.subr.msk.bf16.mxu1 %vm2447_vm2, %v1897_v31  ;;  %v227_v32 = vadd.f32 0.5, %v219_v22 }
 0x190   :  { %1902 = vmatpush3.bf16.xpose.msk.msra.mxu1 %vm2447_vm2, %v1897_v31  ;;  %v252_v31 = vmul.f32 0.125, %v251_v21 }
 0x191   :  { %v1903_v35 = vpack.c.bf16 %v2040_v33, %v2039_v34  ;;  %v221_v33 = vcvt.s32.f32 %v213_v24  ;;  %v232_v34 = vmul.f32 0.125, %v224_v25 }
 0x192   :  { %v2053_v36 = vpop.permute.xlu0 %2052  ;;  %v2043_v37 = vpop.permute.xlu1 %2042 }
 0x193   :  { %v2055_v38 = vunpack.i.h.bf16 %v2053_v36  ;;  %v2054_v39 = vunpack.i.l.bf16 %v2053_v36  ;;  %v2045_v40 = vunpack.i.h.bf16 %v2043_v37  ;;  %v2044_v41 = vunpack.i.l.bf16 %v2043_v37  ;;  %1905 = vmatprep.subr.msk.bf16.mxu1 %vm2447_vm2, %v1903_v35 }
 0x194   :  { %v220_v36 = vcvt.s32.f32 %v212_v28  ;;  %v2003_v37 = vtrunc.f32 %v233_v29 }
 0x195   :  { %v1921_v42 = vpack.c.bf16 %v2055_v38, %v2054_v39  ;;  %v1909_v43 = vpack.c.bf16 %v2045_v40, %v2044_v41  ;;  %v2017_v38 = vtrunc.f32 %v252_v31  ;;  %v235_v39 = vmul.f32 0.125, %v227_v32 }
 0x196   :  { %v2048_v44 = vpop.permute.xlu1 %2047  ;;  %v2063_v47 = vpop.permute.xlu0 %2062  ;;  %v229_v40 = vadd.f32 0.5, %v221_v33  ;;  %v2001_v41 = vtrunc.f32 %v232_v34 }
 0x197   :  { %1922 = vmatprep.subr.bf16.mxu0 %v1921_v42  ;;  %v2050_v45 = vunpack.i.h.bf16 %v2048_v44  ;;  %v2049_v46 = vunpack.i.l.bf16 %v2048_v44  ;;  %v2065_v49 = vunpack.i.h.bf16 %v2063_v47  ;;  %v2064_v50 = vunpack.i.l.bf16 %v2063_v47 }
 0x198   :  { %1908 = vmatpush3.bf16.xpose.msk.msra.mxu1 %vm2447_vm2, %v1903_v35  ;;  %1924 = vmatpush3.bf16.msra.mxu0 %v1921_v42  ;;  %v226_v35 = vadd.f32 0.5, %v218_v27  ;;  %v2004_v44 = vcvt.f32.s32 %v2003_v37  ;;  %v237_v47 = vmul.f32 0.125, %v229_v40 }
 0x199   :  { %1911 = vmatprep.subr.msk.bf16.mxu1 %vm2447_vm2, %v1909_v43  ;;  %v1915_v53 = vpack.c.bf16 %v2050_v45, %v2049_v46  ;;  %v1929_v56 = vpack.c.bf16 %v2065_v49, %v2064_v50  ;;  %v2517_v45 = vcvt.f32.s32 %v2017_v38  ;;  %v2007_v46 = vtrunc.f32 %v235_v39 }
 0x19a   :  { %v2058_v48 = vpop.permute.xlu1 %2057  ;;  %v2068_v57 = vpop.permute.xlu0 %2067  ;;  %v234_v42 = vmul.f32 0.125, %v226_v35  ;;  %v214_v38 = vadd.s32 48, %v2509_v9 }
 0x19b   :  { %v2060_v51 = vunpack.i.h.bf16 %v2058_v48  ;;  %v2059_v52 = vunpack.i.l.bf16 %v2058_v48  ;;  %v2070_v59 = vunpack.i.h.bf16 %v2068_v57  ;;  %v2069_v60 = vunpack.i.l.bf16 %v2068_v57 }
 0x19c   :  { %v2002_v48 = vcvt.f32.s32 %v2001_v41  ;;  %v2005_v49 = vtrunc.f32 %v234_v42  ;;  %vm255_vm3 = vcmp.eq.s32.totalorder %v2004_v44, %v2517_v45  ;;  %v222_v40 = vcvt.s32.f32 %v214_v38 }
 0x19d   :  { %v1925_v54 = vpack.c.bf16 %v2060_v51, %v2059_v52  ;;  %v2467_v0 = vpack.c.bf16 %v2070_v59, %v2069_v60  ;;  %v2008_v51 = vcvt.f32.s32 %v2007_v46  ;;  %v2011_v52 = vtrunc.f32 %v237_v47 }
 0x19e   :  { %v2461_v55 = vpop.permute.xlu1 %2072  ;;  %vm254_vm4 = vcmp.eq.s32.totalorder %v2002_v48, %v2517_v45  ;;  %v230_v42 = vadd.f32 0.5, %v222_v40 }
 0x19f   :  { %1926 = vmatprep.subr.bf16.mxu0 %v1925_v54  ;;  %vm257_vm5 = vcmp.eq.s32.totalorder %v2008_v51, %v2517_v45  ;;  %v2012_v59 = vcvt.f32.s32 %v2011_v52 }
 0x1a0   :  { %1914 = vmatpush3.bf16.xpose.msk.msra.mxu1 %vm2447_vm2, %v1909_v43  ;;  %1928 = vmatpush3.bf16.msra.mxu0 %v1925_v54  ;;  %v228_v43 = vadd.f32 0.5, %v220_v36  ;;  %v2301_v54 = vmov -1e+09   ;;  %v215_v36 = vadd.s32 56, %v2509_v9  ;;  %v238_v44 = vmul.f32 0.125, %v230_v42 }
 0x1a1   :  { %1930 = vmatprep.subr.bf16.mxu0 %v1929_v56  ;;  %1917 = vmatprep.subr.msk.bf16.mxu1 %vm2447_vm2, %v1915_v53  ;;  %v2536_v8 = vsel %vm257_vm5, 0.0, %v2301_v54  ;;  %vm259_vm8 = vcmp.eq.s32.totalorder %v2012_v59, %v2517_v45 }
 0x1a2   :  { %v2078_v58 = vpop.permute.xlu1 %2077  ;;  %v236_v50 = vmul.f32 0.125, %v228_v43  ;;  %v2553_v21 = vsel %vm259_vm8, 0.0, %v2301_v54  ;;  %v223_v37 = vcvt.s32.f32 %v215_v36  ;;  %v2013_v47 = vtrunc.f32 %v238_v44 }
 0x1a3   :  { %v2080_v61 = vunpack.i.h.bf16 %v2078_v58  ;;  %v2079_v62 = vunpack.i.l.bf16 %v2078_v58  ;;  %v2525_v58 = vsel %vm254_vm4, 0.0, %v2301_v54 }
 0x1a4   :  { %1932 = vmatpush3.bf16.msra.mxu0 %v1929_v56  ;;  %v2522_v56 = vsel %vm255_vm3, 0.0, %v2301_v54  ;;  %v2009_v57 = vtrunc.f32 %v236_v50  ;;  %v231_v39 = vadd.f32 0.5, %v223_v37  ;;  %v2014_v48 = vcvt.f32.s32 %v2013_v47 }
 0x1a5   :  { %v1933_v63 = vpack.c.bf16 %v2080_v61, %v2079_v62 }
 0x1a6   :  { %v2010_v10 = vcvt.f32.s32 %v2009_v57  ;;  %v239_v41 = vmul.f32 0.125, %v231_v39  ;;  %vm260_vm11 = vcmp.eq.s32.totalorder %v2014_v48, %v2517_v45 }
 0x1a7   :  { %1934 = vmatprep.subr.bf16.mxu0 %v1933_v63 }
 0x1a8   :  { %1920 = vmatpush3.bf16.xpose.msk.msra.mxu1 %vm2447_vm2, %v1915_v53  ;;  %1936 = vmatpush3.bf16.msra.mxu0 %v1933_v63  ;;  %v2006_v53 = vcvt.f32.s32 %v2005_v49  ;;  %vm258_vm9 = vcmp.eq.s32.totalorder %v2010_v10, %v2517_v45  ;;  %v2015_v43 = vtrunc.f32 %v239_v41 }
 0x1a9   :  { %1939 = vmatprep.subr.msk.bf16.mxu0 %vm2447_vm2, %v2467_v0  ;;  %v2564_v28 = vsel %vm258_vm9, 0.0, %v2301_v54 }
 0x1aa   :  { %vm256_vm7 = vcmp.eq.s32.totalorder %v2006_v53, %v2517_v45  ;;  %v2016_v46 = vcvt.f32.s32 %v2015_v43 }
 0x1ab   :  { %v2541_v12 = vsel %vm256_vm7, 0.0, %v2301_v54 }
 0x1ac   :  { %vm261_vm10 = vcmp.eq.s32.totalorder %v2016_v46, %v2517_v45 }
 0x1ad   :  { %v2584_v9 = vsel %vm261_vm10, 0.0, %v2301_v54 }
 0x1af   :  { %1762 = vmatmul.mubr.msk.f32.vlgmr.msra.gmra.mrb[0].mxu1 %vm306_vm1, %v2475_v1 }
 0x1b0   :  { %1764 = vmatprep.mubr.msk.f32.mxu1 %vm306_vm1, %v2478_v2 }
 0x1b3   :  { %1765 = vmatmul.mubr.msk.f32.gmra.mrb[2].mxu1 %vm306_vm1, %v2485_v3 }
 0x1b4   :  { %1767 = vmatprep.mubr.msk.f32.mxu1 %vm306_vm1, %v2488_v4 }
 0x1b7   :  { %1768 = vmatmul.mubr.msk.f32.gmra.mrb[4].mxu1 %vm306_vm1, %v2495_v5 }
 0x1b8   :  { %1770 = vmatprep.mubr.msk.f32.mxu1 %vm306_vm1, %v2498_v6 }
 0x1bb   :  { %1771 = vmatmul.mubr.msk.f32.gmra.mrb[6].mxu1 %vm306_vm1, %v2505_v7 }
 0x282   :  { %v1763_v60 = vpop.f32.mrb[0].mxu1 }
 0x283   :  { %v2530_v61 = vadd.f32 %v1763_v60, %v2522_v56  ;;  %v413_v62 = vpop.f32.mrb[1].mxu1 }
 0x284   :  { %v2533_v63 = vadd.f32 %v413_v62, %v2525_v58  ;;  %v2074_v62 = vunpack.i.l.bf16 %v2461_v55 }
 0x285   :  { %v456_v11 = vsel %vm452_vm6, %v2530_v61, -inf }
 0x286   :  { %457 = vmax.xlane.f32.xlu1 %v456_v11  ;;  %v1766_v13 = vpop.f32.mrb[2].mxu1  ;;  %v453_v14 = vsel %vm452_vm6, %v2533_v63, -inf }
 0x287   :  { %v2547_v15 = vadd.f32 %v1766_v13, %v2536_v8  ;;  %v423_v18 = vpop.f32.mrb[3].mxu1  ;;  %454 = vmax.xlane.f32.xlu0 %v453_v14 }
 0x288   :  { %v2550_v19 = vadd.f32 %v423_v18, %v2541_v12 }
 0x289   :  { %v462_v22 = vsel %vm452_vm6, %v2547_v15, -inf }
 0x28a   :  { %463 = vmax.xlane.f32.xlu1 %v462_v22  ;;  %v1769_v24 = vpop.f32.mrb[4].mxu1  ;;  %v459_v25 = vsel %vm452_vm6, %v2550_v19, -inf }
 0x28b   :  { %v2561_v27 = vadd.f32 %v1769_v24, %v2553_v21  ;;  %v433_v29 = vpop.f32.mrb[5].mxu1  ;;  %460 = vmax.xlane.f32.xlu0 %v459_v25 }
 0x28c   :  { %v2569_v32 = vadd.f32 %v433_v29, %v2564_v28 }
 0x28d   :  { %v468_v31 = vsel %vm452_vm6, %v2561_v27, -inf }
 0x28e   :  { %v1772_v33 = vpop.f32.mrb[6].mxu1  ;;  %v465_v35 = vsel %vm452_vm6, %v2569_v32, -inf }
 0x28f   :  { %469 = vmax.xlane.f32.xlu0 %v468_v31  ;;  %v443_v34 = vpop.f32.mrb[7].mxu1  ;;  %v2589_v49 = vadd.f32 %v1772_v33, %v2584_v9 }
 0x293   :  { %466 = vmax.xlane.f32.xlu0 %v465_v35 }
 0x29b   :  { %2087 = vrot.lane.b32.xlu1 %v2435_v26, %s2300_s12 }
 0x2a9   :  { %2082 = vrot.lane.b32.xlu0 %v2425_v23, %s2300_s12 }
 0x2ad   :  { %694 = vrot.lane.b32.xlu0 %v2405_v17, %s2302_s13  ;;  %v2592_v17 = vsel %vm260_vm11, 0.0, %v2301_v54 }
 0x2b1   :  { %698 = vrot.lane.b32.xlu0 %v2478_v2, %s2302_s13  ;;  %v2597_v2 = vadd.f32 %v443_v34, %v2592_v17 }
 0x2b5   :  { %702 = vrot.lane.b32.xlu0 %v2488_v4, %s2302_s13  ;;  %v474_v4 = vsel %vm452_vm6, %v2589_v49, -inf }
 0x2b9   :  { %706 = vrot.lane.b32.xlu0 %v2498_v6, %s2302_s13  ;;  %v471_v6 = vsel %vm452_vm6, %v2597_v2, -inf }
 0x2bd   :  { %2092 = vrot.lane.b32.xlu0 %v2403_v16, %s2303_s14 }
 0x2bf   :  { %475 = vmax.xlane.f32.xlu1 %v474_v4 }
 0x2c3   :  { %472 = vmax.xlane.f32.xlu1 %v471_v6 }
 0x2d4   :  { %696 = vrot.lane.b32.xlu1 %v2475_v1, %s2302_s13 }
 0x2d8   :  { %700 = vrot.lane.b32.xlu1 %v2485_v3, %s2302_s13 }
 0x2dc   :  { %704 = vrot.lane.b32.xlu1 %v2495_v5, %s2302_s13 }
 0x2e0   :  { %708 = vrot.lane.b32.xlu1 %v2505_v7, %s2302_s13 }
 0x2e4   :  { %2097 = vrot.lane.b32.xlu1 %v2416_v20, %s2303_s14 }
 0x313   :  { %v458_v16 = vpop.xlane.xlu1 %457 }
 0x314   :  { %v478_v45 = vsub.f32 %v2530_v61, %v458_v16  ;;  %v455_v50 = vpop.xlane.xlu0 %454  ;;  %v2075_v61 = vunpack.i.h.bf16 %v2461_v55 }
 0x315   :  { %v477_v51 = vsub.f32 %v2533_v63, %v455_v50 }
 0x316   :  { %v487_v52 = vmul.f32 1.442695, %v478_v45  ;;  %v1943_v18 = vpack.c.bf16 %v2075_v61, %v2074_v62 }
 0x317   :  { %v485_v53 = vmul.f32 1.442695, %v477_v51  ;;  %v464_v54 = vpop.xlane.xlu1 %463 }
 0x318   :  { %v480_v1 = vsub.f32 %v2547_v15, %v464_v54  ;;  %v461_v57 = vpop.xlane.xlu0 %460 }
 0x319   :  { %2111 = vpow2.f32 %v485_v53  ;;  %v479_v3 = vsub.f32 %v2550_v19, %v461_v57 }
 0x31a   :  { %2113 = vpow2.f32 %v487_v52  ;;  %v491_v5 = vmul.f32 1.442695, %v480_v1 }
 0x31b   :  { %v489_v7 = vmul.f32 1.442695, %v479_v3  ;;  %v2088_v31 = vpop.permute.xlu1 %2087 }
 0x31c   :  { %v470_v59 = vpop.xlane.xlu0 %469  ;;  %v2090_v34 = vunpack.i.h.bf16 %v2088_v31  ;;  %v2089_v35 = vunpack.i.l.bf16 %v2088_v31 }
 0x31d   :  { %2115 = vpow2.f32 %v489_v7  ;;  %v482_v20 = vsub.f32 %v2561_v27, %v470_v59 }
 0x31e   :  { %2117 = vpow2.f32 %v491_v5  ;;  %v1955_v37 = vpack.c.bf16 %v2090_v34, %v2089_v35 }
 0x31f   :  { %v495_v10 = vmul.f32 1.442695, %v482_v20 }
 0x320   :  { %v467_v60 = vpop.xlane.xlu0 %466 }
 0x321   :  { %v481_v63 = vsub.f32 %v2569_v32, %v467_v60 }
 0x323   :  { %v2617_v11 = vpop.eup %2111  ;;  %v493_v13 = vmul.f32 1.442695, %v481_v63 }
 0x324   :  { %v2619_v14 = vpop.eup %2113  ;;  %1789 = vmatprep.mubr.msk.f32.mxu0 %vm452_vm6, %v2617_v11  ;;  %v2083_v15 = vpop.permute.xlu0 %2082 }
 0x325   :  { %2119 = vpow2.f32 %v493_v13  ;;  %1790 = vmatmul.mubr.msk.f32.vlgmr.msra.gmra.mrb[8].mxu0 %vm452_vm6, %v2619_v14  ;;  %v2085_v24 = vunpack.i.h.bf16 %v2083_v15  ;;  %v2084_v25 = vunpack.i.l.bf16 %v2083_v15 }
 0x326   :  { %2121 = vpow2.f32 %v495_v10  ;;  %1942 = vmatpush3.bf16.xpose.msk.msra.mxu0 %vm2447_vm2, %v2467_v0 }
 0x327   :  { %v2628_v55 = vpop.eup %2115  ;;  %1945 = vmatprep.subr.msk.bf16.mxu0 %vm2447_vm2, %v1943_v18  ;;  %v1949_v29 = vpack.c.bf16 %v2085_v24, %v2084_v25 }
 0x328   :  { %v2632_v19 = vpop.eup %2117  ;;  %1792 = vmatprep.mubr.msk.f32.mxu0 %vm452_vm6, %v2628_v55  ;;  %v695_v22 = vpop.permute.xlu0 %694 }
 0x329   :  { %1793 = vmatmul.mubr.msk.f32.gmra.mrb[10].mxu0 %vm452_vm6, %v2632_v19 }
 0x32c   :  { %v699_v27 = vpop.permute.xlu0 %698 }
 0x32e   :  { %1948 = vmatpush3.bf16.xpose.msk.msra.mxu0 %vm2447_vm2, %v1943_v18 }
 0x32f   :  { %v2640_v0 = vpop.eup %2119  ;;  %1951 = vmatprep.subr.msk.bf16.mxu0 %vm2447_vm2, %v1949_v29 }
 0x330   :  { %v2644_v32 = vpop.eup %2121  ;;  %1795 = vmatprep.mubr.msk.f32.mxu0 %vm452_vm6, %v2640_v0  ;;  %v703_v33 = vpop.permute.xlu0 %702 }
 0x331   :  { %1796 = vmatmul.mubr.msk.f32.gmra.mrb[12].mxu0 %vm452_vm6, %v2644_v32 }
 0x334   :  { %v707_v36 = vpop.permute.xlu0 %706 }
 0x336   :  { %1954 = vmatpush3.bf16.xpose.msk.msra.mxu0 %vm2447_vm2, %v1949_v29 }
 0x337   :  { %1957 = vmatprep.subr.msk.bf16.mxu0 %vm2447_vm2, %v1955_v37 }
 0x338   :  { %v2093_v38 = vpop.permute.xlu0 %2092 }
 0x339   :  { %v2095_v39 = vunpack.i.h.bf16 %v2093_v38  ;;  %v2094_v40 = vunpack.i.l.bf16 %v2093_v38 }
 0x33b   :  { %v1961_v41 = vpack.c.bf16 %v2095_v39, %v2094_v40 }
 0x33d   :  { %1985 = vmatprep.subr.bf16.mxu1 %v1961_v41 }
 0x33e   :  { %1960 = vmatpush3.bf16.xpose.msk.msra.mxu0 %vm2447_vm2, %v1955_v37  ;;  %1989 = vmatpush3.bf16.msra.mxu1 %v1961_v41 }
 0x33f   :  { %1962 = vmatprep.subr.bf16.mxu0 %v1961_v41 }
 0x34c   :  { %v476_v42 = vpop.xlane.xlu1 %475 }
 0x34d   :  { %v484_v43 = vsub.f32 %v2589_v49, %v476_v42 }
 0x34f   :  { %v499_v47 = vmul.f32 1.442695, %v484_v43 }
 0x350   :  { %v473_v44 = vpop.xlane.xlu1 %472 }
 0x351   :  { %v483_v46 = vsub.f32 %v2597_v2, %v473_v44 }
 0x353   :  { %v497_v48 = vmul.f32 1.442695, %v483_v46 }
 0x354   :  { %v697_v4 = vpop.permute.xlu1 %696 }
 0x355   :  { %2123 = vpow2.f32 %v497_v48 }
 0x356   :  { %2125 = vpow2.f32 %v499_v47 }
 0x358   :  { %v701_v6 = vpop.permute.xlu1 %700 }
 0x35c   :  { %v705_v16 = vpop.permute.xlu1 %704 }
 0x35f   :  { %v2658_v45 = vpop.eup %2123 }
 0x360   :  { %v2660_v50 = vpop.eup %2125  ;;  %1798 = vmatprep.mubr.msk.f32.mxu0 %vm452_vm6, %v2658_v45  ;;  %v709_v30 = vpop.permute.xlu1 %708 }
 0x361   :  { %1799 = vmatmul.mubr.msk.f32.gmra.mrb[14].mxu0 %vm452_vm6, %v2660_v50 }
 0x362   :  { %1817 = vmatprep.mubr.msk.f32.mxu0 %vm306_vm1, %v695_v22 }
 0x364   :  { %v2098_v49 = vpop.permute.xlu1 %2097 }
 0x365   :  { %v2100_v2 = vunpack.i.h.bf16 %v2098_v49  ;;  %v2099_v51 = vunpack.i.l.bf16 %v2098_v49  ;;  %1818 = vmatmul.mubr.msk.f32.vlgmr.msra.gmra.mrb[16].mxu0 %vm306_vm1, %v697_v4 }
 0x366   :  { %1964 = vmatpush3.bf16.msra.mxu0 %v1961_v41  ;;  %1820 = vmatprep.mubr.msk.f32.mxu0 %vm306_vm1, %v699_v27 }
 0x367   :  { %v1965_v52 = vpack.c.bf16 %v2100_v2, %v2099_v51 }
 0x369   :  { %1821 = vmatmul.mubr.msk.f32.gmra.mrb[18].mxu0 %vm306_vm1, %v701_v6  ;;  %1966 = vmatprep.subr.bf16.mxu0 %v1965_v52 }
 0x36a   :  { %1986 = vmatprep.subr.bf16.mxu1 %v1965_v52  ;;  %1823 = vmatprep.mubr.msk.f32.mxu0 %vm306_vm1, %v703_v33 }
 0x36b   :  { %1968 = vmatpush3.bf16.msra.mxu0 %v1965_v52  ;;  %1990 = vmatpush3.bf16.msra.mxu1 %v1965_v52 }
 0x36d   :  { %1824 = vmatmul.mubr.msk.f32.gmra.mrb[20].mxu0 %vm306_vm1, %v705_v16 }
 0x36e   :  { %1826 = vmatprep.mubr.msk.f32.mxu0 %vm306_vm1, %v707_v36 }
 0x371   :  { %1827 = vmatmul.mubr.msk.f32.gmra.mrb[22].mxu0 %vm306_vm1, %v709_v30 }
 0x3f8   :  { %v2674_v53 = vpop.f32.mrb[8].mxu0 }
 0x3f9   :  { %v2676_v54 = vpop.f32.mrb[9].mxu0 }
 0x3fc   :  { %v2678_v1 = vpop.f32.mrb[10].mxu0 }
 0x3fd   :  { %v2680_v57 = vpop.f32.mrb[11].mxu0 }
 0x404   :  { %v2682_v3 = vpop.f32.mrb[12].mxu0 }
 0x405   :  { %v2684_v5 = vpop.f32.mrb[13].mxu0 }
 0x434   :  { %v2686_v7 = vpop.f32.mrb[14].mxu0 }
 0x435   :  { %v2688_v59 = vpop.f32.mrb[15].mxu0 }
 0x438   :  { %v1819_v20 = vpop.f32.mrb[16].mxu0 }
 0x439   :  { %v830_v60 = vadd.f32 %v1819_v20, %v2522_v56  ;;  %v824_v61 = vpop.f32.mrb[17].mxu0 }
 0x43a   :  { %v825_v62 = vadd.f32 %v824_v61, %v2525_v58 }
 0x43b   :  { %v866_v63 = vsel %vm452_vm6, %v830_v60, -inf }
 0x43c   :  { %867 = vmax.xlane.f32.xlu1 %v866_v63  ;;  %v1822_v10 = vpop.f32.mrb[18].mxu0  ;;  %v863_v13 = vsel %vm452_vm6, %v825_v62, -inf }
 0x43d   :  { %v840_v15 = vadd.f32 %v1822_v10, %v2536_v8  ;;  %864 = vmax.xlane.f32.xlu0 %v863_v13  ;;  %v834_v18 = vpop.f32.mrb[19].mxu0 }
 0x43e   :  { %v835_v24 = vadd.f32 %v834_v18, %v2541_v12 }
 0x43f   :  { %v872_v22 = vsel %vm452_vm6, %v840_v15, -inf }
 0x440   :  { %v1825_v25 = vpop.f32.mrb[20].mxu0  ;;  %v869_v31 = vsel %vm452_vm6, %v835_v24, -inf }
 0x441   :  { %873 = vmax.xlane.f32.xlu0 %v872_v22  ;;  %v844_v56 = vpop.f32.mrb[21].mxu0  ;;  %v850_v58 = vadd.f32 %v1825_v25, %v2553_v21 }
 0x442   :  { %v845_v27 = vadd.f32 %v844_v56, %v2564_v28 }
 0x443   :  { %v878_v36 = vsel %vm452_vm6, %v850_v58, -inf }
 0x444   :  { %v1828_v29 = vpop.f32.mrb[22].mxu0  ;;  %v875_v33 = vsel %vm452_vm6, %v845_v27, -inf }
 0x445   :  { %v860_v8 = vadd.f32 %v1828_v29, %v2584_v9  ;;  %870 = vmax.xlane.f32.xlu0 %v869_v31  ;;  %876 = vmax.xlane.f32.xlu1 %v875_v33  ;;  %v854_v34 = vpop.f32.mrb[23].mxu0 }
 0x446   :  { %v855_v12 = vadd.f32 %v854_v34, %v2592_v17 }
 0x447   :  { %v884_v35 = vsel %vm452_vm6, %v860_v8, -inf }
 0x448   :  { %v881_v21 = vsel %vm452_vm6, %v855_v12, -inf }
 0x449   :  { %879 = vmax.xlane.f32.xlu0 %v878_v36  ;;  %885 = vmax.xlane.f32.xlu1 %v884_v35 }
 0x44d   :  { %882 = vmax.xlane.f32.xlu1 %v881_v21 }
 0x45e   :  { %2107 = vrot.lane.b32.xlu1 %v2435_v26, %s2303_s14 }
 0x45f   :  { %2102 = vrot.lane.b32.xlu0 %v2425_v23, %s2303_s14 }
 0x4c9   :  { %v868_v28 = vpop.xlane.xlu1 %867 }
 0x4ca   :  { %v888_v9 = vsub.f32 %v830_v60, %v868_v28  ;;  %v865_v37 = vpop.xlane.xlu0 %864  ;;  %v501_v28 = vsel %vm452_vm6, %v2617_v11, 0.0  ;;  %v516_v11 = vsel %vm452_vm6, %v2644_v32, 0.0 }
 0x4cb   :  { %v887_v38 = vsub.f32 %v825_v62, %v865_v37  ;;  %v507_v37 = vsel %vm452_vm6, %v2628_v55, 0.0  ;;  %v272_v55 = vld [vmem:[#allocation7 + $0x10] sm:$0xff] }
 0x4cc   :  { %v897_v39 = vmul.f32 1.442695, %v888_v9  ;;  %v504_v9 = vsel %vm452_vm6, %v2619_v14, 0.0  ;;  %v522_v14 = vsel %vm452_vm6, %v2660_v50, 0.0 }
 0x4cd   :  { %v895_v40 = vmul.f32 1.442695, %v887_v38  ;;  %v510_v38 = vsel %vm452_vm6, %v2632_v19, 0.0 }
 0x4ce   :  { %2127 = vpow2.f32 %v897_v39  ;;  %v874_v17 = vpop.xlane.xlu0 %873  ;;  %v513_v39 = vsel %vm452_vm6, %v2640_v0, 0.0  ;;  %v270_v0 = vld [vmem:[#allocation7] sm:$0xff] }
 0x4cf   :  { %2129 = vpow2.f32 %v895_v40  ;;  %v890_v41 = vsub.f32 %v840_v15, %v874_v17  ;;  %v519_v40 = vsel %vm452_vm6, %v2658_v45, 0.0  ;;  %v273_v17 = vld [vmem:[#allocation7 + $0x18] sm:$0xff] }
 0x4d0   :  { %v1977_v19 = vpack.c.bf16 %v273_v17, %v272_v55 }
 0x4d1   :  { %v901_v47 = vmul.f32 1.442695, %v890_v41  ;;  %v271_v41 = vld [vmem:[#allocation7 + $0x8] sm:$0xff] }
 0x4d2   :  { %v871_v42 = vpop.xlane.xlu0 %870  ;;  %v877_v43 = vpop.xlane.xlu1 %876 }
 0x4d3   :  { %v889_v44 = vsub.f32 %v835_v24, %v871_v42  ;;  %v891_v46 = vsub.f32 %v845_v27, %v877_v43  ;;  %v1981_v42 = vpack.c.bf16 %v271_v41, %v270_v0 }
 0x4d5   :  { %v899_v48 = vmul.f32 1.442695, %v889_v44  ;;  %v903_v26 = vmul.f32 1.442695, %v891_v46 }
 0x4d6   :  { %v880_v4 = vpop.xlane.xlu0 %879  ;;  %v886_v6 = vpop.xlane.xlu1 %885 }
 0x4d7   :  { %2131 = vpow2.f32 %v899_v48  ;;  %v892_v23 = vsub.f32 %v850_v58, %v880_v4  ;;  %v894_v2 = vsub.f32 %v860_v8, %v886_v6 }
 0x4d8   :  { %v2128_v16 = vpop.eup %2127  ;;  %2133 = vpow2.f32 %v903_v26 }
 0x4d9   :  { %v2130_v30 = vpop.eup %2129  ;;  %2135 = vpow2.f32 %v901_v47  ;;  %v905_v49 = vmul.f32 1.442695, %v892_v23  ;;  %v914_v51 = vsel %vm452_vm6, %v2128_v16, 0.0  ;;  %v909_v10 = vmul.f32 1.442695, %v894_v2 }
 0x4da   :  { %v2103_v52 = vpop.permute.xlu0 %2102  ;;  %1845 = vmatprep.mubr.msk.f32.mxu0 %vm452_vm6, %v2130_v30  ;;  %915 = vadd.xlane.f32.xlu1 %v914_v51  ;;  %v883_v20 = vpop.xlane.xlu1 %882  ;;  %v911_v60 = vsel %vm452_vm6, %v2130_v30, 0.0 }
 0x4db   :  { %v2105_v61 = vunpack.i.h.bf16 %v2103_v52  ;;  %v2104_v62 = vunpack.i.l.bf16 %v2103_v52  ;;  %v893_v63 = vsub.f32 %v855_v12, %v883_v20  ;;  %912 = vadd.xlane.f32.xlu0 %v911_v60  ;;  %2137 = vpow2.f32 %v905_v49 }
 0x4dd   :  { %v1969_v13 = vpack.c.bf16 %v2105_v61, %v2104_v62  ;;  %v907_v15 = vmul.f32 1.442695, %v893_v63 }
 0x4de   :  { %v2108_v18 = vpop.permute.xlu1 %2107 }
 0x4df   :  { %2139 = vpow2.f32 %v907_v15  ;;  %v2110_v22 = vunpack.i.h.bf16 %v2108_v18  ;;  %v2109_v24 = vunpack.i.l.bf16 %v2108_v18  ;;  %1970 = vmatprep.subr.bf16.mxu0 %v1969_v13  ;;  %1987 = vmatprep.subr.bf16.mxu1 %v1969_v13 }
 0x4e0   :  { %1972 = vmatpush3.bf16.msra.mxu0 %v1969_v13  ;;  %1991 = vmatpush3.bf16.msra.mxu1 %v1969_v13  ;;  %2141 = vpow2.f32 %v909_v10 }
 0x4e1   :  { %v2132_v25 = vpop.eup %2131  ;;  %v1973_v56 = vpack.c.bf16 %v2110_v22, %v2109_v24 }
 0x4e2   :  { %v2134_v27 = vpop.eup %2133  ;;  %v917_v58 = vsel %vm452_vm6, %v2132_v25, 0.0 }
 0x4e3   :  { %v2136_v29 = vpop.eup %2135  ;;  %918 = vadd.xlane.f32.xlu0 %v917_v58  ;;  %v923_v31 = vsel %vm452_vm6, %v2134_v27, 0.0  ;;  %1974 = vmatprep.subr.bf16.mxu0 %v1973_v56 }
 0x4e4   :  { %924 = vadd.xlane.f32.xlu1 %v923_v31  ;;  %1988 = vmatprep.subr.bf16.mxu1 %v1973_v56  ;;  %v920_v33 = vsel %vm452_vm6, %v2136_v29, 0.0 }
 0x4e5   :  { %1976 = vmatpush3.bf16.msra.mxu0 %v1973_v56  ;;  %1992 = vmatpush3.bf16.msra.mxu1 %v1973_v56  ;;  %v2138_v8 = vpop.eup %2137 }
 0x4e6   :  { %v926_v35 = vsel %vm452_vm6, %v2138_v8, 0.0  ;;  %1978 = vmatprep.subr.bf16.mxu1 %v1977_v19 }
 0x4e7   :  { %921 = vadd.xlane.f32.xlu0 %v920_v33 }
 0x4e8   :  { %1846 = vmatmul.mubr.msk.f32.vlgmr.msra.gmra.mrb[24].mxu0 %vm452_vm6, %v2128_v16 }
 0x4e9   :  { %v2140_v34 = vpop.eup %2139  ;;  %1848 = vmatprep.mubr.msk.f32.mxu0 %vm452_vm6, %v2132_v25 }
 0x4ea   :  { %1854 = vmatprep.mubr.msk.f32.mxu1 %vm452_vm6, %v2140_v34  ;;  %v929_v12 = vsel %vm452_vm6, %v2140_v34, 0.0  ;;  %v2142_v36 = vpop.eup %2141 }
 0x4eb   :  { %927 = vadd.xlane.f32.xlu0 %v926_v35  ;;  %930 = vadd.xlane.f32.xlu1 %v929_v12  ;;  %v932_v21 = vsel %vm452_vm6, %v2142_v36, 0.0 }
 0x4ec   :  { %1849 = vmatmul.mubr.msk.f32.gmra.mrb[26].mxu0 %vm452_vm6, %v2136_v29  ;;  %1855 = vmatmul.mubr.msk.f32.vlgmr.msra.gmra.mrb[8].mxu1 %vm452_vm6, %v2142_v36 }
 0x4ed   :  { %1851 = vmatprep.mubr.msk.f32.mxu0 %vm452_vm6, %v2134_v27  ;;  %1980 = vmatpush3.bf16.msra.mxu1 %v1977_v19 }
 0x4ee   :  { %1982 = vmatprep.subr.bf16.mxu1 %v1981_v42 }
 0x4ef   :  { %933 = vadd.xlane.f32.xlu0 %v932_v21  ;;  %502 = vadd.xlane.f32.xlu1 %v501_v28 }
 0x4f0   :  { %1852 = vmatmul.mubr.msk.f32.gmra.mrb[28].mxu0 %vm452_vm6, %v2138_v8 }
 0x4f3   :  { %505 = vadd.xlane.f32.xlu0 %v504_v9  ;;  %508 = vadd.xlane.f32.xlu1 %v507_v37 }
 0x4f7   :  { %511 = vadd.xlane.f32.xlu0 %v510_v38  ;;  %514 = vadd.xlane.f32.xlu1 %v513_v39 }
 0x4fb   :  { %517 = vadd.xlane.f32.xlu0 %v516_v11  ;;  %520 = vadd.xlane.f32.xlu1 %v519_v40 }
 0x4ff   :  { %523 = vadd.xlane.f32.xlu0 %v522_v14 }
 0x567   :  { %v916_v46 = vpop.xlane.xlu1 %915 }
 0x568   :  { %v913_v43 = vpop.xlane.xlu0 %912 }
 0x569   :  { %2143 = vrcp.f32 %v913_v43 }
 0x56a   :  { %2145 = vrcp.f32 %v916_v46  ;;  %v2191_v46 = vld [vmem:[#allocation2 + $0x8] sm:$0xff] }
 0x570   :  { %v919_v32 = vpop.xlane.xlu0 %918 }
 0x571   :  { %v925_v45 = vpop.xlane.xlu1 %924  ;;  %2147 = vrcp.f32 %v919_v32 }
 0x573   :  { %v2144_v16 = vpop.eup %2143 }
 0x574   :  { %v922_v44 = vpop.xlane.xlu0 %921  ;;  %v2146_v49 = vpop.eup %2145 }
 0x575   :  { %2149 = vrcp.f32 %v922_v44 }
 0x576   :  { %2151 = vrcp.f32 %v925_v45 }
 0x578   :  { %v928_v47 = vpop.xlane.xlu0 %927  ;;  %v931_v48 = vpop.xlane.xlu1 %930 }
 0x579   :  { %2153 = vrcp.f32 %v928_v47 }
 0x57a   :  { %2155 = vrcp.f32 %v931_v48  ;;  %v2192_v48 = vld [vmem:[#allocation2] sm:$0xff] }
 0x57b   :  { %v2148_v61 = vpop.eup %2147 }
 0x57c   :  { %v934_v26 = vpop.xlane.xlu0 %933  ;;  %v503_v50 = vpop.xlane.xlu1 %502 }
 0x57d   :  { %2157 = vrcp.f32 %v503_v50 }
 0x57e   :  { %2159 = vrcp.f32 %v934_v26 }
 0x57f   :  { %v2150_v10 = vpop.eup %2149 }
 0x580   :  { %v506_v4 = vpop.xlane.xlu0 %505  ;;  %v509_v6 = vpop.xlane.xlu1 %508 }
 0x581   :  { %2161 = vrcp.f32 %v506_v4  ;;  %v2152_v24 = vpop.eup %2151 }
 0x582   :  { %2163 = vrcp.f32 %v509_v6 }
 0x583   :  { %v2154_v27 = vpop.eup %2153 }
 0x584   :  { %v512_v51 = vpop.xlane.xlu0 %511  ;;  %v515_v13 = vpop.xlane.xlu1 %514 }
 0x585   :  { %2165 = vrcp.f32 %v512_v51  ;;  %v2156_v29 = vpop.eup %2155 }
 0x586   :  { %2167 = vrcp.f32 %v515_v13 }
 0x587   :  { %v2158_v34 = vpop.eup %2157 }
 0x588   :  { %v518_v25 = vpop.xlane.xlu0 %517  ;;  %v521_v33 = vpop.xlane.xlu1 %520  ;;  %v686_v28 = vmul.f32 %v2158_v34, %v2676_v54  ;;  %v2198_v34 = vld [vmem:[#allocation2 + $0x30] sm:$0xff] }
 0x589   :  { %v2160_v35 = vpop.eup %2159  ;;  %2169 = vrcp.f32 %v518_v25  ;;  %v2196_v25 = vld [vmem:[#allocation2 + $0x20] sm:$0xff] }
 0x58a   :  { %2171 = vrcp.f32 %v521_v33  ;;  %v2197_v33 = vld [vmem:[#allocation2 + $0x38] sm:$0xff] }
 0x58b   :  { %v2162_v21 = vpop.eup %2161 }
 0x58c   :  { %v524_v12 = vpop.xlane.xlu0 %523  ;;  %v2164_v9 = vpop.eup %2163  ;;  %v687_v37 = vmul.f32 %v2162_v21, %v2674_v53 }
 0x58d   :  { %2173 = vrcp.f32 %v524_v12  ;;  %v688_v39 = vmul.f32 %v2164_v9, %v2680_v57 }
 0x58f   :  { %v2166_v38 = vpop.eup %2165 }
 0x590   :  { %v2168_v11 = vpop.eup %2167  ;;  %v689_v40 = vmul.f32 %v2166_v38, %v2678_v1  ;;  %v1626_v1 = vld [vmem:[%s2857_s3] ss:$0 sm:$0xff] }
 0x591   :  { %v690_v54 = vmul.f32 %v2168_v11, %v2684_v5 }
 0x593   :  { %v2170_v14 = vpop.eup %2169 }
 0x594   :  { %v2172_v55 = vpop.eup %2171  ;;  %v691_v53 = vmul.f32 %v2170_v14, %v2682_v3 }
 0x595   :  { %v692_v57 = vmul.f32 %v2172_v55, %v2688_v59 }
 0x597   :  { %v2174_v17 = vpop.eup %2173 }
 0x598   :  { %v693_v19 = vmul.f32 %v2174_v17, %v2686_v7 }
 0x5bb   :  { %v1847_v23 = vpop.f32.mrb[24].mxu0 }
 0x5bc   :  { %v1049_v30 = vpop.f32.mrb[25].mxu0  ;;  %v1097_v52 = vmul.f32 %v2146_v49, %v1847_v23  ;;  %v2193_v49 = vld [vmem:[#allocation2 + $0x18] sm:$0xff] }
 0x5bd   :  { %v1096_v2 = vmul.f32 %v2144_v16, %v1049_v30 }
 0x5bf   :  { %v1850_v20 = vpop.f32.mrb[26].mxu0  ;;  %v1856_v60 = vpop.f32.mrb[8].mxu1  ;;  %1861 = vmatprep.mubr.msk.f32.mxu1 %vm306_vm1, %v1096_v2 }
 0x5c0   :  { %v1059_v62 = vpop.f32.mrb[27].mxu0  ;;  %v1079_v63 = vpop.f32.mrb[9].mxu1  ;;  %1862 = vmatmul.mubr.msk.f32.vlgmr.msra.gmra.mrb[10].mxu1 %vm306_vm1, %v1097_v52  ;;  %v1099_v18 = vmul.f32 %v2150_v10, %v1850_v20  ;;  %v1103_v36 = vmul.f32 %v2160_v35, %v1856_v60  ;;  %v2194_v52 = vld [vmem:[#allocation2 + $0x10] sm:$0xff] }
 0x5c1   :  { %v1098_v15 = vmul.f32 %v2148_v61, %v1059_v62  ;;  %1984 = vmatpush3.bf16.msra.mxu1 %v1981_v42  ;;  %v1102_v8 = vmul.f32 %v2156_v29, %v1079_v63 }
 0x5c3   :  { %v1853_v22 = vpop.f32.mrb[28].mxu0  ;;  %1864 = vmatprep.mubr.msk.f32.mxu1 %vm306_vm1, %v1098_v15 }
 0x5c4   :  { %v1069_v56 = vpop.f32.mrb[29].mxu0  ;;  %1865 = vmatmul.mubr.msk.f32.gmra.mrb[12].mxu1 %vm306_vm1, %v1099_v18  ;;  %v1101_v31 = vmul.f32 %v2154_v27, %v1853_v22  ;;  %v2195_v18 = vld [vmem:[#allocation2 + $0x28] sm:$0xff] }
 0x5c5   :  { %v1100_v58 = vmul.f32 %v2152_v24, %v1069_v56 }
 0x5c7   :  { %1867 = vmatprep.mubr.msk.f32.mxu1 %vm306_vm1, %v1100_v58 }
 0x5c8   :  { %1868 = vmatmul.mubr.msk.f32.gmra.mrb[14].mxu1 %vm306_vm1, %v1101_v31 }
 0x5c9   :  { %1870 = vmatprep.mubr.msk.f32.mxu1 %vm306_vm1, %v1102_v8 }
 0x5cc   :  { %1871 = vmatmul.mubr.msk.f32.gmra.mrb[16].mxu1 %vm306_vm1, %v1103_v36 }
 0x5cd   :  { %1877 = vmatprep.mubr.msk.f32.mxu1 %vm306_vm1, %v686_v28 }
 0x5d0   :  { %1878 = vmatmul.mubr.msk.f32.vlgmr.msra.gmra.mrb[10].mxu1 %vm306_vm1, %v687_v37 }
 0x5d1   :  { %1880 = vmatprep.mubr.msk.f32.mxu1 %vm306_vm1, %v688_v39 }
 0x5d4   :  { %1881 = vmatmul.mubr.msk.f32.gmra.mrb[12].mxu1 %vm306_vm1, %v689_v40 }
 0x5d5   :  { %1883 = vmatprep.mubr.msk.f32.mxu1 %vm306_vm1, %v690_v54 }
 0x5d8   :  { %1884 = vmatmul.mubr.msk.f32.gmra.mrb[14].mxu1 %vm306_vm1, %v691_v53 }
 0x5d9   :  { %1886 = vmatprep.mubr.msk.f32.mxu1 %vm306_vm1, %v692_v57 }
 0x5dc   :  { %1887 = vmatmul.mubr.msk.f32.gmra.mrb[16].mxu1 %vm306_vm1, %v693_v19 }
 0x6a3   :  { %v1879_v5 = vpop.f32.mrb[10].mxu1 }
 0x6a4   :  { %v1370_v0 = vadd.f32 %v1879_v5, %v1626_v1  ;;  %v1323_v41 = vpop.f32.mrb[11].mxu1 }
 0x6a5   :  { %v1369_v42 = vadd.f32 %v1626_v1, %v1323_v41 }
 0x6a6   :  { %v1378_v3 = vmax.f32 %v1370_v0, 0.0 }
 0x6a7   :  { %v1377_v43 = vmax.f32 %v1369_v42, 0.0  ;;  %v1882_v32 = vpop.f32.mrb[12].mxu1 }
 0x6a8   :  { %v1372_v59 = vadd.f32 %v1882_v32, %v1626_v1  ;;  %v1333_v44 = vpop.f32.mrb[13].mxu1  ;;  %v1386_v45 = vadd.f32 %v2191_v46, %v1378_v3 }
 0x6a9   :  { %v1371_v47 = vadd.f32 %v1626_v1, %v1333_v44  ;;  %v1385_v7 = vadd.f32 %v2192_v48, %v1377_v43 }
 0x6aa   :  { %v1380_v26 = vmax.f32 %v1372_v59, 0.0  ;;  %v1396_v50 = vsel %vm77_vm0, %v1386_v45, 0.0 }
 0x6ab   :  { %v1379_v4 = vmax.f32 %v1371_v47, 0.0  ;;  %1397 = vadd.xlane.f32.xlu0 %v1396_v50  ;;  %v1885_v6 = vpop.f32.mrb[14].mxu1  ;;  %v1393_v23 = vsel %vm77_vm0, %v1385_v7, 0.0 }
 0x6ac   :  { %v1374_v16 = vadd.f32 %v1885_v6, %v1626_v1  ;;  %1394 = vadd.xlane.f32.xlu1 %v1393_v23  ;;  %v1343_v30 = vpop.f32.mrb[15].mxu1  ;;  %v1388_v2 = vadd.f32 %v2193_v49, %v1380_v26 }
 0x6ad   :  { %v1373_v51 = vadd.f32 %v1626_v1, %v1343_v30  ;;  %v1387_v20 = vadd.f32 %v2194_v52, %v1379_v4 }
 0x6ae   :  { %v1382_v60 = vmax.f32 %v1374_v16, 0.0  ;;  %v1402_v61 = vsel %vm77_vm0, %v1388_v2, 0.0 }
 0x6af   :  { %v1381_v62 = vmax.f32 %v1373_v51, 0.0  ;;  %1403 = vadd.xlane.f32.xlu0 %v1402_v61  ;;  %v1888_v63 = vpop.f32.mrb[16].mxu1  ;;  %v1399_v10 = vsel %vm77_vm0, %v1387_v20, 0.0 }
 0x6b0   :  { %v1376_v13 = vadd.f32 %v1888_v63, %v1626_v1  ;;  %1400 = vadd.xlane.f32.xlu1 %v1399_v10  ;;  %v1353_v15 = vpop.f32.mrb[17].mxu1  ;;  %v1390_v22 = vadd.f32 %v2195_v18, %v1382_v60 }
 0x6b1   :  { %v1375_v24 = vadd.f32 %v1626_v1, %v1353_v15  ;;  %v1389_v56 = vadd.f32 %v2196_v25, %v1381_v62 }
 0x6b2   :  { %v1384_v27 = vmax.f32 %v1376_v13, 0.0  ;;  %v1408_v58 = vsel %vm77_vm0, %v1390_v22, 0.0 }
 0x6b3   :  { %v1383_v29 = vmax.f32 %v1375_v24, 0.0  ;;  %1409 = vadd.xlane.f32.xlu0 %v1408_v58  ;;  %v1405_v31 = vsel %vm77_vm0, %v1389_v56, 0.0 }
 0x6b4   :  { %1406 = vadd.xlane.f32.xlu1 %v1405_v31  ;;  %v1392_v8 = vadd.f32 %v2197_v33, %v1384_v27 }
 0x6b5   :  { %v1391_v35 = vadd.f32 %v2198_v34, %v1383_v29 }
 0x6b6   :  { %v1414_v12 = vsel %vm77_vm0, %v1392_v8, 0.0 }
 0x6b7   :  { %1415 = vadd.xlane.f32.xlu0 %v1414_v12  ;;  %v1411_v36 = vsel %vm77_vm0, %v1391_v35, 0.0 }
 0x6b8   :  { %1412 = vadd.xlane.f32.xlu1 %v1411_v36  ;;  %v1627_v36 = vld [vmem:[%s2858_s4] ss:$0 sm:$0xff]  ;;  %s2304_s4 = smov [#allocation8]  }
 0x738   :  { %v1398_v21 = vpop.xlane.xlu0 %1397 }
 0x739   :  { %v1419_v28 = vmul.f32 0.03125, %v1398_v21  ;;  %v1395_v9 = vpop.xlane.xlu1 %1394 }
 0x73a   :  { %v1418_v37 = vmul.f32 0.03125, %v1395_v9 }
 0x73b   :  { %v2777_v38 = vsub.f32 %v1386_v45, %v1419_v28 }
 0x73c   :  { %v2779_v39 = vsub.f32 %v1385_v7, %v1418_v37  ;;  %v1404_v11 = vpop.xlane.xlu0 %1403 }
 0x73d   :  { %v1421_v40 = vmul.f32 0.03125, %v1404_v11  ;;  %v1401_v14 = vpop.xlane.xlu1 %1400  ;;  %v1435_v54 = vmul.f32 %v2777_v38, %v2777_v38  ;;  %v1628_v11 = vld [vmem:[%s2859_s5] ss:$0 sm:$0xff]  ;;  %s1541_s5 = sshll.u32 %s2304_s4, 4  ;;  %s1542_s5 = int_to_ptr.vmem [resolvable:$true] %s1541_s5 }
 0x73e   :  { %v1420_v55 = vmul.f32 0.03125, %v1401_v14  ;;  %v1434_v53 = vmul.f32 %v2779_v39, %v2779_v39  ;;  %s2265_s20 = scalar_lea.vmem %s1542_s5, 1024  ;;  %p2270_p11 = scmp.lt.s32.totalorder %s1542_s5, %s1542_s5 }
 0x73f   :  { %v2785_v17 = vsub.f32 %v1388_v2, %v1421_v40  ;;  %v1445_v57 = vsel %vm77_vm0, %v1435_v54, 0.0  ;;  %p2266_p10 = scmp.ne.s32.totalorder %s1542_s5, %s2265_s20  ;;  %p2271_p12 = scmp.lt.s32.totalorder %s2265_s20, %s2265_s20 }
 0x740   :  { %v2788_v19 = vsub.f32 %v1387_v20, %v1420_v55  ;;  %v1410_v1 = vpop.xlane.xlu0 %1409  ;;  %1446 = vadd.xlane.f32.xlu0 %v1445_v57  ;;  %v1442_v5 = vsel %vm77_vm0, %v1434_v53, 0.0 }
 0x741   :  { %v1423_v0 = vmul.f32 0.03125, %v1410_v1  ;;  %v1407_v41 = vpop.xlane.xlu1 %1406  ;;  %1443 = vadd.xlane.f32.xlu1 %v1442_v5  ;;  %v1437_v42 = vmul.f32 %v2785_v17, %v2785_v17  ;;  %p2272_p13 = por %p2271_p12, %p2270_p11 }
 0x742   :  { %v1422_v3 = vmul.f32 0.03125, %v1407_v41  ;;  %v1436_v43 = vmul.f32 %v2788_v19, %v2788_v19 }
 0x743   :  { %v2795_v32 = vsub.f32 %v1390_v22, %v1423_v0  ;;  %v1451_v59 = vsel %vm77_vm0, %v1437_v42, 0.0  ;;  %p2273_p0 = pnand %p2272_p13, %p2266_p10 }
 0x744   :  { %v2798_v44 = vsub.f32 %v1389_v56, %v1422_v3  ;;  %1452 = vadd.xlane.f32.xlu0 %v1451_v59  ;;  %v1416_v46 = vpop.xlane.xlu0 %1415  ;;  %v1448_v45 = vsel %vm77_vm0, %v1436_v43, 0.0 }
 0x745   :  { %v1425_v47 = vmul.f32 0.03125, %v1416_v46  ;;  %1449 = vadd.xlane.f32.xlu1 %v1448_v45  ;;  %v1413_v48 = vpop.xlane.xlu1 %1412  ;;  %v1439_v7 = vmul.f32 %v2795_v32, %v2795_v32 }
 0x746   :  { %v1424_v26 = vmul.f32 0.03125, %v1413_v48  ;;  %v1438_v50 = vmul.f32 %v2798_v44, %v2798_v44 }
 0x747   :  { %v2805_v4 = vsub.f32 %v1392_v8, %v1425_v47  ;;  %v1457_v6 = vsel %vm77_vm0, %v1439_v7, 0.0 }
 0x748   :  { %v2808_v23 = vsub.f32 %v1391_v35, %v1424_v26  ;;  %1458 = vadd.xlane.f32.xlu0 %v1457_v6  ;;  %v1454_v16 = vsel %vm77_vm0, %v1438_v50, 0.0 }
 0x749   :  { %1455 = vadd.xlane.f32.xlu1 %v1454_v16  ;;  %v1441_v30 = vmul.f32 %v2805_v4, %v2805_v4 }
 0x74a   :  { %v1440_v49 = vmul.f32 %v2808_v23, %v2808_v23 }
 0x74b   :  { %v1463_v2 = vsel %vm77_vm0, %v1441_v30, 0.0 }
 0x74c   :  { %1464 = vadd.xlane.f32.xlu0 %v1463_v2  ;;  %v1460_v51 = vsel %vm77_vm0, %v1440_v49, 0.0 }
 0x74d   :  { %1461 = vadd.xlane.f32.xlu1 %v1460_v51 }
 0x7cd   :  { %v1447_v52 = vpop.xlane.xlu0 %1446 }
 0x7ce   :  { %v1467_v20 = vmul.f32 0.03125, %v1447_v52  ;;  %v1444_v60 = vpop.xlane.xlu1 %1443 }
 0x7cf   :  { %v1466_v61 = vmul.f32 0.03125, %v1444_v60 }
 0x7d0   :  { %v1475_v62 = vadd.f32 1e-06, %v1467_v20 }
 0x7d1   :  { %v1474_v63 = vadd.f32 1e-06, %v1466_v61  ;;  %v1453_v10 = vpop.xlane.xlu0 %1452 }
 0x7d2   :  { %2175 = vrsqrt.f32 %v1475_v62  ;;  %v1469_v13 = vmul.f32 0.03125, %v1453_v10  ;;  %v1450_v15 = vpop.xlane.xlu1 %1449 }
 0x7d3   :  { %2177 = vrsqrt.f32 %v1474_v63  ;;  %v1468_v18 = vmul.f32 0.03125, %v1450_v15 }
 0x7d4   :  { %v1477_v22 = vadd.f32 1e-06, %v1469_v13 }
 0x7d5   :  { %v1476_v24 = vadd.f32 1e-06, %v1468_v18  ;;  %v1459_v25 = vpop.xlane.xlu0 %1458 }
 0x7d6   :  { %2179 = vrsqrt.f32 %v1477_v22  ;;  %v1471_v56 = vmul.f32 0.03125, %v1459_v25  ;;  %v1456_v27 = vpop.xlane.xlu1 %1455 }
 0x7d7   :  { %2181 = vrsqrt.f32 %v1476_v24  ;;  %v1470_v58 = vmul.f32 0.03125, %v1456_v27 }
 0x7d8   :  { %v1479_v29 = vadd.f32 1e-06, %v1471_v56 }
 0x7d9   :  { %v1478_v31 = vadd.f32 1e-06, %v1470_v58  ;;  %v1465_v33 = vpop.xlane.xlu0 %1464 }
 0x7da   :  { %2183 = vrsqrt.f32 %v1479_v29  ;;  %v1473_v8 = vmul.f32 0.03125, %v1465_v33  ;;  %v1462_v34 = vpop.xlane.xlu1 %1461 }
 0x7db   :  { %2185 = vrsqrt.f32 %v1478_v31  ;;  %v1472_v35 = vmul.f32 0.03125, %v1462_v34 }
 0x7dc   :  { %v2176_v12 = vpop.eup %2175  ;;  %v1481_v21 = vadd.f32 1e-06, %v1473_v8 }
 0x7dd   :  { %v2178_v28 = vpop.eup %2177  ;;  %v1491_v9 = vmul.f32 %v2176_v12, %v2777_v38  ;;  %v1480_v37 = vadd.f32 1e-06, %v1472_v35 }
 0x7de   :  { %v1490_v40 = vmul.f32 %v2178_v28, %v2779_v39  ;;  %2187 = vrsqrt.f32 %v1481_v21 }
 0x7df   :  { %v1506_v14 = vmul.f32 %v1627_v36, %v1491_v9  ;;  %2189 = vrsqrt.f32 %v1480_v37 }
 0x7e0   :  { %v2180_v54 = vpop.eup %2179  ;;  %v1505_v55 = vmul.f32 %v1627_v36, %v1490_v40 }
 0x7e1   :  { %v2182_v53 = vpop.eup %2181  ;;  %v1521_v57 = vadd.f32 %v1628_v11, %v1506_v14  ;;  %v1493_v1 = vmul.f32 %v2180_v54, %v2785_v17 }
 0x7e2   :  { %v1520_v5 = vadd.f32 %v1628_v11, %v1505_v55  ;;  %v1492_v0 = vmul.f32 %v2182_v53, %v2788_v19 }
 0x7e3   :  { %1529 = vst.msk [vmem:[#allocation8 + $0x8] sm:$0xff] %vm77_vm0, %v1521_v57  ;;  %v1508_v38 = vmul.f32 %v1627_v36, %v1493_v1 }
 0x7e4   :  { %v2184_v41 = vpop.eup %2183  ;;  %1528 = vst.msk [vmem:[#allocation8] sm:$0xff] %vm77_vm0, %v1520_v5  ;;  %v1507_v42 = vmul.f32 %v1627_v36, %v1492_v0 }
 0x7e5   :  { %v2186_v39 = vpop.eup %2185  ;;  %v1523_v3 = vadd.f32 %v1628_v11, %v1508_v38  ;;  %v1495_v43 = vmul.f32 %v2184_v41, %v2795_v32 }
 0x7e6   :  { %v1522_v59 = vadd.f32 %v1628_v11, %v1507_v42  ;;  %v1494_v46 = vmul.f32 %v2186_v39, %v2798_v44 }
 0x7e7   :  { %1531 = vst.msk [vmem:[#allocation8 + $0x18] sm:$0xff] %vm77_vm0, %v1523_v3  ;;  %v1510_v17 = vmul.f32 %v1627_v36, %v1495_v43 }
 0x7e8   :  { %v2188_v45 = vpop.eup %2187  ;;  %1530 = vst.msk [vmem:[#allocation8 + $0x10] sm:$0xff] %vm77_vm0, %v1522_v59  ;;  %v1509_v19 = vmul.f32 %v1627_v36, %v1494_v46 }
 0x7e9   :  { %v2190_v47 = vpop.eup %2189  ;;  %v1525_v48 = vadd.f32 %v1628_v11, %v1510_v17  ;;  %v1497_v7 = vmul.f32 %v2188_v45, %v2805_v4 }
 0x7ea   :  { %v1524_v26 = vadd.f32 %v1628_v11, %v1509_v19  ;;  %v1496_v50 = vmul.f32 %v2190_v47, %v2808_v23 }
 0x7eb   :  { %1533 = vst.msk [vmem:[#allocation8 + $0x28] sm:$0xff] %vm77_vm0, %v1525_v48  ;;  %v1512_v32 = vmul.f32 %v1627_v36, %v1497_v7 }
 0x7ec   :  { %1532 = vst.msk [vmem:[#allocation8 + $0x20] sm:$0xff] %vm77_vm0, %v1524_v26  ;;  %v1511_v44 = vmul.f32 %v1627_v36, %v1496_v50 }
 0x7ed   :  { %v1527_v6 = vadd.f32 %v1628_v11, %v1512_v32 }
 0x7ee   :  { %v1526_v16 = vadd.f32 %v1628_v11, %v1511_v44 }
 0x7ef   :  { %1535 = vst.msk [vmem:[#allocation8 + $0x38] sm:$0xff] %vm77_vm0, %v1527_v6 }
 0x7f0   :  { %1534 = vst.msk [vmem:[#allocation8 + $0x30] sm:$0xff] %vm77_vm0, %v1526_v16 }
 0x7f1   :  { %2276 = shalt.err (!%p2273_p0)
}
 0x7f2   :  { %s2277_s22 = scalar_lea.hbm %s2860_s6, 1024 }
 0x7f3   :  { %p2278_p1 = scmp.ne.s32.totalorder %s2860_s6, %s2277_s22  ;;  %p2281_p2 = scmp.lt.u32.totalorder %s2277_s22, %s2860_s6 }
 0x7f5   :  { %p2283_p3 = pnand %p2281_p2, %p2278_p1 }
 0x7f7   :  { %2286 = shalt.err (!%p2283_p3)
}
 0x7f8   :  { %1547 = dma.vmem_to_hbm [thread:$0]  %s1542_s5, 1024, %s2860_s6, [#allocation4], %s2295_s9, %s2295_s9, %s2296_s10  }
 0x7f9   :  { %2291 = dma.done.wait [#allocation4], 1024  }
 0x7fa   :  { %2292 = vsyncadd [#allocation4], 4294966272 }
 0x7fb   :  { %1551 = vsyncpa [#allocation3], 1 }
 0x7fc   :  { %1552 = vsyncpa [#allocation6], 1 }
 0x7fd   :  { %1553 = vsyncpa [#allocation4], 1 }

</bundles_post_ra>
